<compile_context>
chip_gen: v7x
topology: tpu7x:2x2x1
jax: 0.10.0
libtpu: 0.0.40
codegen_flags: <defaults>
</compile_context>

<pallas_src>
import functools

import jax
import jax.numpy as jnp
from jax import lax
from jax.experimental import pallas as pl
from jax.experimental.pallas import tpu as pltpu


def _round_up(x, m):
    return ((x + m - 1) // m) * m


def _pick_tcout(cout):
    """Cout tile: 128 on v5e-class chips, 256 otherwise (must divide cout)."""
    t = 256
    try:
        kind = jax.devices()[0].device_kind.lower()
        if "v5 lite" in kind or "v5e" in kind or "v5lite" in kind:
            t = 128
    except Exception:
        pass
    t = min(t, cout)
    while cout % t:
        t //= 2
    return max(t, 1)


def _conv3x3_bn_relu_kernel(x_ref, w_ref, scale_ref, bias_ref, o_ref, acc_ref,
                            *, H, W, Wp):
    """One (image, cout-tile) grid step.

    x_ref:     ((H+3)*Wp, Cin)  bf16  flattened zero-padded image (row pitch Wp)
    w_ref:     (3, 3, Cin, Tco) bf16  HWIO weight tile
    scale_ref: (1, Tco)         f32   folded BN scale
    bias_ref:  (1, Tco)         f32   folded BN bias
    o_ref:     (H, W, Tco)            output tile
    acc_ref:   (H*Wp, Tco)      f32   VMEM scratch accumulator
    """
    M = H * Wp
    acc_ref[...] = jnp.zeros_like(acc_ref)

    # 3x3 conv = 9 shifted matmuls on the MXU. Tap (dy, dx) needs input rows
    # starting at flat offset dy*Wp + dx; because the row pitch Wp is a
    # multiple of 8, each tap is a simple row-window load (no reshapes).
    for dy in range(3):
        for dx in range(3):
            start = dy * Wp + dx
            xs = x_ref[start:start + M, :]                     # (M, Cin) bf16
            acc_ref[...] += jnp.dot(xs, w_ref[dy, dx],
                                    preferred_element_type=jnp.float32)

    y = acc_ref[...] * scale_ref[...] + bias_ref[...]          # BN (folded), f32
    y = jnp.maximum(y, 0.0)                                    # ReLU
    # Drop the padded-width garbage columns (q >= W) and store.
    o_ref[...] = y.reshape(H, Wp, -1)[:, :W, :].astype(o_ref.dtype)


def conv3x3_bn_relu(x_nhwc, w_hwio, scale, bias, out_dtype=jnp.float32):
    """x_nhwc: (N,H,W,Cin); w_hwio: (3,3,Cin,Cout); scale/bias: (Cout,)."""
    N, H, W, Cin = x_nhwc.shape
    Cout = w_hwio.shape[-1]
    tcout = _pick_tcout(Cout)

    # Pad so the row pitch Wp is a multiple of 8 and >= W+2, with one top and
    # two bottom zero rows so every tap's row window stays in bounds.
    Wp = max(_round_up(W + 2, 8), 8)
    x_bf16 = x_nhwc.astype(jnp.bfloat16)
    xp = jnp.pad(x_bf16, ((0, 0), (1, 2), (1, Wp - W - 1), (0, 0)))
    FR = (H + 3) * Wp
    x_flat = xp.reshape(N, FR, Cin)

    wq = w_hwio.astype(jnp.bfloat16)
    scale2 = scale.reshape(1, Cout).astype(jnp.float32)
    bias2 = bias.reshape(1, Cout).astype(jnp.float32)

    kernel = functools.partial(_conv3x3_bn_relu_kernel, H=H, W=W, Wp=Wp)

    return pl.pallas_call(
        kernel,
        out_shape=jax.ShapeDtypeStruct((N, H, W, Cout), out_dtype),
        grid_spec=pltpu.PrefetchScalarGridSpec(
            num_scalar_prefetch=0,
            grid=(N, Cout // tcout),
            in_specs=[
                pl.BlockSpec((None, FR, Cin), lambda n, c: (n, 0, 0)),
                pl.BlockSpec((3, 3, Cin, tcout), lambda n, c: (0, 0, 0, c)),
                pl.BlockSpec((1, tcout), lambda n, c: (0, c)),
                pl.BlockSpec((1, tcout), lambda n, c: (0, c)),
            ],
            out_specs=pl.BlockSpec((None, H, W, tcout),
                                   lambda n, c: (n, 0, 0, c)),
            scratch_shapes=[pltpu.VMEM((H * Wp, tcout), jnp.float32)],
        ),
        compiler_params=pltpu.CompilerParams(
            dimension_semantics=("parallel", "parallel"),
            vmem_limit_bytes=48 << 20,   # fits v7x's 64 MiB physical VMEM
        ),
    )(x_flat, wq, scale2, bias2)


def make_params(key, features, out_features=(128, 256, 512)):
    """Deterministic synthetic parameters (conv HWIO weights + folded BN)."""
    params = []
    cin = features
    for cout in out_features:
        k_w, k_g, k_b, k_m, k_v, key = jax.random.split(key, 6)
        fan_in = cin * 3 * 3
        w = jax.random.normal(k_w, (3, 3, cin, cout), jnp.float32) / jnp.sqrt(fan_in)
        gamma = 1.0 + 0.1 * jax.random.normal(k_g, (cout,), jnp.float32)
        beta = 0.1 * jax.random.normal(k_b, (cout,), jnp.float32)
        rmean = 0.1 * jax.random.normal(k_m, (cout,), jnp.float32)
        rvar = jnp.abs(jax.random.normal(k_v, (cout,), jnp.float32)) + 0.5
        eps = 1e-5
        scale = gamma / jnp.sqrt(rvar + eps)      # fold BN (eval mode)
        bias = beta - rmean * scale
        params.append((w, scale, bias))
        cin = cout
    return params


def prepare_self_attention_forward(x_nchw, params):
    """Forward pass matching PREPARE_SELF_ATTENTION_MODULE (BN in eval mode)."""
    x = jnp.transpose(x_nchw, (0, 2, 3, 1))       # NCHW -> NHWC
    n_layers = len(params)
    for i, (w, scale, bias) in enumerate(params):
        out_dtype = jnp.float32 if i == n_layers - 1 else jnp.bfloat16
        x = conv3x3_bn_relu(x, w, scale, bias, out_dtype=out_dtype)
    return jnp.transpose(x, (0, 3, 1, 2))         # NHWC -> NCHW


def _reference_forward(x_nchw, params):
    """Pure-JAX (XLA conv) reference with matching bf16 operand quantization."""
    x = jnp.transpose(x_nchw, (0, 2, 3, 1))
    for (w, scale, bias) in params:
        y = lax.conv_general_dilated(
            x.astype(jnp.bfloat16), w.astype(jnp.bfloat16),
            window_strides=(1, 1), padding=((1, 1), (1, 1)),
            dimension_numbers=("NHWC", "HWIO", "NHWC"),
            preferred_element_type=jnp.float32)
        y = y * scale[None, None, None, :] + bias[None, None, None, :]
        x = jnp.maximum(y, 0.0)
    return jnp.transpose(x, (0, 3, 1, 2))


if __name__ == "__main__":
    key = jax.random.PRNGKey(0)
    k_x, k_p = jax.random.split(key)

    N, C, H, W = 2, 4, 16, 16                     # small NCHW input
    x = jax.random.normal(k_x, (N, C, H, W), jnp.float32)
    params = make_params(k_p, features=C)

    out = jax.block_until_ready(prepare_self_attention_forward(x, params))
    assert out.shape == (N, 512, H, W), out.shape

    ref = jax.block_until_ready(_reference_forward(x, params))
    err = float(jnp.max(jnp.abs(out - ref)))
    assert err < 1e-2, f"max abs err {err}"

    print("KERNEL_OK")
</pallas_src>

<mosaic_0001>
module attributes {stable_mosaic.version = 11 : i64} {
  func.func @_conv3x3_bn_relu_kernel(%arg0: i32, %arg1: i32, %arg2: memref<1x456x4xbf16, #tpu.memory_space<vmem>>, %arg3: memref<3x3x4x128xbf16, #tpu.memory_space<vmem>>, %arg4: memref<1x128xf32, #tpu.memory_space<vmem>>, %arg5: memref<1x128xf32, #tpu.memory_space<vmem>>, %arg6: memref<1x16x16x128xbf16, #tpu.memory_space<vmem>>, %arg7: memref<384x128xf32, #tpu.memory_space<vmem>>) attributes {dimension_semantics = [#tpu.dimension_semantics<parallel>, #tpu.dimension_semantics<parallel>], iteration_bounds = array<i64: 2, 1>, scalar_prefetch = 0 : i64, scratch_operands = 1 : i64, tpu.core_type = #tpu.core_type<tc>, window_params = [{transform_indices = @transform_0, window_bounds = array<i64: 1, 456, 4>}, {transform_indices = @transform_1, window_bounds = array<i64: 3, 3, 4, 128>}, {transform_indices = @transform_2, window_bounds = array<i64: 1, 128>}, {transform_indices = @transform_3, window_bounds = array<i64: 1, 128>}, {transform_indices = @transform_4, window_bounds = array<i64: 1, 16, 16, 128>}]} {
    %cst = arith.constant 0.000000e+00 : f32
    %0 = vector.broadcast %cst : f32 to vector<384x128xf32>
    %c0 = arith.constant 0 : index
    %c0_0 = arith.constant 0 : index
    %1 = vector.load %arg7[%c0, %c0_0] : memref<384x128xf32, #tpu.memory_space<vmem>>, vector<384x128xf32>
    tpu.vector_store %arg7[%c0, %c0_0], %0 {strides = array<i32>} : memref<384x128xf32, #tpu.memory_space<vmem>>, vector<384x128xf32>,
    %c0_1 = arith.constant 0 : index
    %c0_2 = arith.constant 0 : index
    %c0_3 = arith.constant 0 : index
    %2 = vector.load %arg2[%c0_1, %c0_2, %c0_3] : memref<1x456x4xbf16, #tpu.memory_space<vmem>>, vector<1x384x4xbf16>
    %3 = vector.shape_cast %2 : vector<1x384x4xbf16> to vector<384x4xbf16>
    %c0_4 = arith.constant 0 : index
    %c0_5 = arith.constant 0 : index
    %4 = vector.load %arg7[%c0_4, %c0_5] : memref<384x128xf32, #tpu.memory_space<vmem>>, vector<384x128xf32>
    %c0_6 = arith.constant 0 : index
    %c0_7 = arith.constant 0 : index
    %c0_8 = arith.constant 0 : index
    %c0_9 = arith.constant 0 : index
    %5 = vector.load %arg3[%c0_6, %c0_7, %c0_8, %c0_9] : memref<3x3x4x128xbf16, #tpu.memory_space<vmem>>, vector<1x1x4x128xbf16>
    %6 = vector.shape_cast %5 : vector<1x1x4x128xbf16> to vector<4x128xbf16>
    %cst_10 = arith.constant dense<0.000000e+00> : vector<384x128xf32>
    %7 = tpu.matmul %3, %6, %cst_10 {dimension_numbers = #tpu.dot_dimension_numbers<[1], [0], [0], [1], [0, 0, 1, 1], [], []>} : vector<384x4xbf16>, vector<4x128xbf16>, vector<384x128xf32> -> vector<384x128xf32>
    %8 = arith.addf %4, %7 : vector<384x128xf32>
    %c0_11 = arith.constant 0 : index
    %c0_12 = arith.constant 0 : index
    %9 = vector.load %arg7[%c0_11, %c0_12] : memref<384x128xf32, #tpu.memory_space<vmem>>, vector<384x128xf32>
    tpu.vector_store %arg7[%c0_11, %c0_12], %8 {strides = array<i32>} : memref<384x128xf32, #tpu.memory_space<vmem>>, vector<384x128xf32>,
    %c0_13 = arith.constant 0 : index
    %c1 = arith.constant 1 : index
    %c0_14 = arith.constant 0 : index
    %10 = vector.load %arg2[%c0_13, %c1, %c0_14] : memref<1x456x4xbf16, #tpu.memory_space<vmem>>, vector<1x384x4xbf16>
    %11 = vector.shape_cast %10 : vector<1x384x4xbf16> to vector<384x4xbf16>
    %c0_15 = arith.constant 0 : index
    %c0_16 = arith.constant 0 : index
    %12 = vector.load %arg7[%c0_15, %c0_16] : memref<384x128xf32, #tpu.memory_space<vmem>>, vector<384x128xf32>
    %c0_17 = arith.constant 0 : index
    %c1_18 = arith.constant 1 : index
    %c0_19 = arith.constant 0 : index
    %c0_20 = arith.constant 0 : index
    %13 = vector.load %arg3[%c0_17, %c1_18, %c0_19, %c0_20] : memref<3x3x4x128xbf16, #tpu.memory_space<vmem>>, vector<1x1x4x128xbf16>
    %14 = vector.shape_cast %13 : vector<1x1x4x128xbf16> to vector<4x128xbf16>
    %cst_21 = arith.constant dense<0.000000e+00> : vector<384x128xf32>
    %15 = tpu.matmul %11, %14, %cst_21 {dimension_numbers = #tpu.dot_dimension_numbers<[1], [0], [0], [1], [0, 0, 1, 1], [], []>} : vector<384x4xbf16>, vector<4x128xbf16>, vector<384x128xf32> -> vector<384x128xf32>
    %16 = arith.addf %12, %15 : vector<384x128xf32>
    %c0_22 = arith.constant 0 : index
    %c0_23 = arith.constant 0 : index
    %17 = vector.load %arg7[%c0_22, %c0_23] : memref<384x128xf32, #tpu.memory_space<vmem>>, vector<384x128xf32>
    tpu.vector_store %arg7[%c0_22, %c0_23], %16 {strides = array<i32>} : memref<384x128xf32, #tpu.memory_space<vmem>>, vector<384x128xf32>,
    %c0_24 = arith.constant 0 : index
    %c2 = arith.constant 2 : index
    %c0_25 = arith.constant 0 : index
    %18 = vector.load %arg2[%c0_24, %c2, %c0_25] : memref<1x456x4xbf16, #tpu.memory_space<vmem>>, vector<1x384x4xbf16>
    %19 = vector.shape_cast %18 : vector<1x384x4xbf16> to vector<384x4xbf16>
    %c0_26 = arith.constant 0 : index
    %c0_27 = arith.constant 0 : index
    %20 = vector.load %arg7[%c0_26, %c0_27] : memref<384x128xf32, #tpu.memory_space<vmem>>, vector<384x128xf32>
    %c0_28 = arith.constant 0 : index
    %c2_29 = arith.constant 2 : index
    %c0_30 = arith.constant 0 : index
    %c0_31 = arith.constant 0 : index
    %21 = vector.load %arg3[%c0_28, %c2_29, %c0_30, %c0_31] : memref<3x3x4x128xbf16, #tpu.memory_space<vmem>>, vector<1x1x4x128xbf16>
    %22 = vector.shape_cast %21 : vector<1x1x4x128xbf16> to vector<4x128xbf16>
    %cst_32 = arith.constant dense<0.000000e+00> : vector<384x128xf32>
    %23 = tpu.matmul %19, %22, %cst_32 {dimension_numbers = #tpu.dot_dimension_numbers<[1], [0], [0], [1], [0, 0, 1, 1], [], []>} : vector<384x4xbf16>, vector<4x128xbf16>, vector<384x128xf32> -> vector<384x128xf32>
    %24 = arith.addf %20, %23 : vector<384x128xf32>
    %c0_33 = arith.constant 0 : index
    %c0_34 = arith.constant 0 : index
    %25 = vector.load %arg7[%c0_33, %c0_34] : memref<384x128xf32, #tpu.memory_space<vmem>>, vector<384x128xf32>
    tpu.vector_store %arg7[%c0_33, %c0_34], %24 {strides = array<i32>} : memref<384x128xf32, #tpu.memory_space<vmem>>, vector<384x128xf32>,
    %c0_35 = arith.constant 0 : index
    %c24 = arith.constant 24 : index
    %c0_36 = arith.constant 0 : index
    %26 = vector.load %arg2[%c0_35, %c24, %c0_36] : memref<1x456x4xbf16, #tpu.memory_space<vmem>>, vector<1x384x4xbf16>
    %27 = vector.shape_cast %26 : vector<1x384x4xbf16> to vector<384x4xbf16>
    %c0_37 = arith.constant 0 : index
    %c0_38 = arith.constant 0 : index
    %28 = vector.load %arg7[%c0_37, %c0_38] : memref<384x128xf32, #tpu.memory_space<vmem>>, vector<384x128xf32>
    %c1_39 = arith.constant 1 : index
    %c0_40 = arith.constant 0 : index
    %c0_41 = arith.constant 0 : index
    %c0_42 = arith.constant 0 : index
    %29 = vector.load %arg3[%c1_39, %c0_40, %c0_41, %c0_42] : memref<3x3x4x128xbf16, #tpu.memory_space<vmem>>, vector<1x1x4x128xbf16>
    %30 = vector.shape_cast %29 : vector<1x1x4x128xbf16> to vector<4x128xbf16>
    %cst_43 = arith.constant dense<0.000000e+00> : vector<384x128xf32>
    %31 = tpu.matmul %27, %30, %cst_43 {dimension_numbers = #tpu.dot_dimension_numbers<[1], [0], [0], [1], [0, 0, 1, 1], [], []>} : vector<384x4xbf16>, vector<4x128xbf16>, vector<384x128xf32> -> vector<384x128xf32>
    %32 = arith.addf %28, %31 : vector<384x128xf32>
    %c0_44 = arith.constant 0 : index
    %c0_45 = arith.constant 0 : index
    %33 = vector.load %arg7[%c0_44, %c0_45] : memref<384x128xf32, #tpu.memory_space<vmem>>, vector<384x128xf32>
    tpu.vector_store %arg7[%c0_44, %c0_45], %32 {strides = array<i32>} : memref<384x128xf32, #tpu.memory_space<vmem>>, vector<384x128xf32>,
    %c0_46 = arith.constant 0 : index
    %c25 = arith.constant 25 : index
    %c0_47 = arith.constant 0 : index
    %34 = vector.load %arg2[%c0_46, %c25, %c0_47] : memref<1x456x4xbf16, #tpu.memory_space<vmem>>, vector<1x384x4xbf16>
    %35 = vector.shape_cast %34 : vector<1x384x4xbf16> to vector<384x4xbf16>
    %c0_48 = arith.constant 0 : index
    %c0_49 = arith.constant 0 : index
    %36 = vector.load %arg7[%c0_48, %c0_49] : memref<384x128xf32, #tpu.memory_space<vmem>>, vector<384x128xf32>
    %c1_50 = arith.constant 1 : index
    %c1_51 = arith.constant 1 : index
    %c0_52 = arith.constant 0 : index
    %c0_53 = arith.constant 0 : index
    %37 = vector.load %arg3[%c1_50, %c1_51, %c0_52, %c0_53] : memref<3x3x4x128xbf16, #tpu.memory_space<vmem>>, vector<1x1x4x128xbf16>
    %38 = vector.shape_cast %37 : vector<1x1x4x128xbf16> to vector<4x128xbf16>
    %cst_54 = arith.constant dense<0.000000e+00> : vector<384x128xf32>
    %39 = tpu.matmul %35, %38, %cst_54 {dimension_numbers = #tpu.dot_dimension_numbers<[1], [0], [0], [1], [0, 0, 1, 1], [], []>} : vector<384x4xbf16>, vector<4x128xbf16>, vector<384x128xf32> -> vector<384x128xf32>
    %40 = arith.addf %36, %39 : vector<384x128xf32>
    %c0_55 = arith.constant 0 : index
    %c0_56 = arith.constant 0 : index
    %41 = vector.load %arg7[%c0_55, %c0_56] : memref<384x128xf32, #tpu.memory_space<vmem>>, vector<384x128xf32>
    tpu.vector_store %arg7[%c0_55, %c0_56], %40 {strides = array<i32>} : memref<384x128xf32, #tpu.memory_space<vmem>>, vector<384x128xf32>,
    %c0_57 = arith.constant 0 : index
    %c26 = arith.constant 26 : index
    %c0_58 = arith.constant 0 : index
    %42 = vector.load %arg2[%c0_57, %c26, %c0_58] : memref<1x456x4xbf16, #tpu.memory_space<vmem>>, vector<1x384x4xbf16>
    %43 = vector.shape_cast %42 : vector<1x384x4xbf16> to vector<384x4xbf16>
    %c0_59 = arith.constant 0 : index
    %c0_60 = arith.constant 0 : index
    %44 = vector.load %arg7[%c0_59, %c0_60] : memref<384x128xf32, #tpu.memory_space<vmem>>, vector<384x128xf32>
    %c1_61 = arith.constant 1 : index
    %c2_62 = arith.constant 2 : index
    %c0_63 = arith.constant 0 : index
    %c0_64 = arith.constant 0 : index
    %45 = vector.load %arg3[%c1_61, %c2_62, %c0_63, %c0_64] : memref<3x3x4x128xbf16, #tpu.memory_space<vmem>>, vector<1x1x4x128xbf16>
    %46 = vector.shape_cast %45 : vector<1x1x4x128xbf16> to vector<4x128xbf16>
    %cst_65 = arith.constant dense<0.000000e+00> : vector<384x128xf32>
    %47 = tpu.matmul %43, %46, %cst_65 {dimension_numbers = #tpu.dot_dimension_numbers<[1], [0], [0], [1], [0, 0, 1, 1], [], []>} : vector<384x4xbf16>, vector<4x128xbf16>, vector<384x128xf32> -> vector<384x128xf32>
    %48 = arith.addf %44, %47 : vector<384x128xf32>
    %c0_66 = arith.constant 0 : index
    %c0_67 = arith.constant 0 : index
    %49 = vector.load %arg7[%c0_66, %c0_67] : memref<384x128xf32, #tpu.memory_space<vmem>>, vector<384x128xf32>
    tpu.vector_store %arg7[%c0_66, %c0_67], %48 {strides = array<i32>} : memref<384x128xf32, #tpu.memory_space<vmem>>, vector<384x128xf32>,
    %c0_68 = arith.constant 0 : index
    %c48 = arith.constant 48 : index
    %c0_69 = arith.constant 0 : index
    %50 = vector.load %arg2[%c0_68, %c48, %c0_69] : memref<1x456x4xbf16, #tpu.memory_space<vmem>>, vector<1x384x4xbf16>
    %51 = vector.shape_cast %50 : vector<1x384x4xbf16> to vector<384x4xbf16>
    %c0_70 = arith.constant 0 : index
    %c0_71 = arith.constant 0 : index
    %52 = vector.load %arg7[%c0_70, %c0_71] : memref<384x128xf32, #tpu.memory_space<vmem>>, vector<384x128xf32>
    %c2_72 = arith.constant 2 : index
    %c0_73 = arith.constant 0 : index
    %c0_74 = arith.constant 0 : index
    %c0_75 = arith.constant 0 : index
    %53 = vector.load %arg3[%c2_72, %c0_73, %c0_74, %c0_75] : memref<3x3x4x128xbf16, #tpu.memory_space<vmem>>, vector<1x1x4x128xbf16>
    %54 = vector.shape_cast %53 : vector<1x1x4x128xbf16> to vector<4x128xbf16>
    %cst_76 = arith.constant dense<0.000000e+00> : vector<384x128xf32>
    %55 = tpu.matmul %51, %54, %cst_76 {dimension_numbers = #tpu.dot_dimension_numbers<[1], [0], [0], [1], [0, 0, 1, 1], [], []>} : vector<384x4xbf16>, vector<4x128xbf16>, vector<384x128xf32> -> vector<384x128xf32>
    %56 = arith.addf %52, %55 : vector<384x128xf32>
    %c0_77 = arith.constant 0 : index
    %c0_78 = arith.constant 0 : index
    %57 = vector.load %arg7[%c0_77, %c0_78] : memref<384x128xf32, #tpu.memory_space<vmem>>, vector<384x128xf32>
    tpu.vector_store %arg7[%c0_77, %c0_78], %56 {strides = array<i32>} : memref<384x128xf32, #tpu.memory_space<vmem>>, vector<384x128xf32>,
    %c0_79 = arith.constant 0 : index
    %c49 = arith.constant 49 : index
    %c0_80 = arith.constant 0 : index
    %58 = vector.load %arg2[%c0_79, %c49, %c0_80] : memref<1x456x4xbf16, #tpu.memory_space<vmem>>, vector<1x384x4xbf16>
    %59 = vector.shape_cast %58 : vector<1x384x4xbf16> to vector<384x4xbf16>
    %c0_81 = arith.constant 0 : index
    %c0_82 = arith.constant 0 : index
    %60 = vector.load %arg7[%c0_81, %c0_82] : memref<384x128xf32, #tpu.memory_space<vmem>>, vector<384x128xf32>
    %c2_83 = arith.constant 2 : index
    %c1_84 = arith.constant 1 : index
    %c0_85 = arith.constant 0 : index
    %c0_86 = arith.constant 0 : index
    %61 = vector.load %arg3[%c2_83, %c1_84, %c0_85, %c0_86] : memref<3x3x4x128xbf16, #tpu.memory_space<vmem>>, vector<1x1x4x128xbf16>
    %62 = vector.shape_cast %61 : vector<1x1x4x128xbf16> to vector<4x128xbf16>
    %cst_87 = arith.constant dense<0.000000e+00> : vector<384x128xf32>
    %63 = tpu.matmul %59, %62, %cst_87 {dimension_numbers = #tpu.dot_dimension_numbers<[1], [0], [0], [1], [0, 0, 1, 1], [], []>} : vector<384x4xbf16>, vector<4x128xbf16>, vector<384x128xf32> -> vector<384x128xf32>
    %64 = arith.addf %60, %63 : vector<384x128xf32>
    %c0_88 = arith.constant 0 : index
    %c0_89 = arith.constant 0 : index
    %65 = vector.load %arg7[%c0_88, %c0_89] : memref<384x128xf32, #tpu.memory_space<vmem>>, vector<384x128xf32>
    tpu.vector_store %arg7[%c0_88, %c0_89], %64 {strides = array<i32>} : memref<384x128xf32, #tpu.memory_space<vmem>>, vector<384x128xf32>,
    %c0_90 = arith.constant 0 : index
    %c50 = arith.constant 50 : index
    %c0_91 = arith.constant 0 : index
    %66 = vector.load %arg2[%c0_90, %c50, %c0_91] : memref<1x456x4xbf16, #tpu.memory_space<vmem>>, vector<1x384x4xbf16>
    %67 = vector.shape_cast %66 : vector<1x384x4xbf16> to vector<384x4xbf16>
    %c0_92 = arith.constant 0 : index
    %c0_93 = arith.constant 0 : index
    %68 = vector.load %arg7[%c0_92, %c0_93] : memref<384x128xf32, #tpu.memory_space<vmem>>, vector<384x128xf32>
    %c2_94 = arith.constant 2 : index
    %c2_95 = arith.constant 2 : index
    %c0_96 = arith.constant 0 : index
    %c0_97 = arith.constant 0 : index
    %69 = vector.load %arg3[%c2_94, %c2_95, %c0_96, %c0_97] : memref<3x3x4x128xbf16, #tpu.memory_space<vmem>>, vector<1x1x4x128xbf16>
    %70 = vector.shape_cast %69 : vector<1x1x4x128xbf16> to vector<4x128xbf16>
    %cst_98 = arith.constant dense<0.000000e+00> : vector<384x128xf32>
    %71 = tpu.matmul %67, %70, %cst_98 {dimension_numbers = #tpu.dot_dimension_numbers<[1], [0], [0], [1], [0, 0, 1, 1], [], []>} : vector<384x4xbf16>, vector<4x128xbf16>, vector<384x128xf32> -> vector<384x128xf32>
    %72 = arith.addf %68, %71 : vector<384x128xf32>
    %c0_99 = arith.constant 0 : index
    %c0_100 = arith.constant 0 : index
    %73 = vector.load %arg7[%c0_99, %c0_100] : memref<384x128xf32, #tpu.memory_space<vmem>>, vector<384x128xf32>
    tpu.vector_store %arg7[%c0_99, %c0_100], %72 {strides = array<i32>} : memref<384x128xf32, #tpu.memory_space<vmem>>, vector<384x128xf32>,
    %c0_101 = arith.constant 0 : index
    %c0_102 = arith.constant 0 : index
    %74 = vector.load %arg7[%c0_101, %c0_102] : memref<384x128xf32, #tpu.memory_space<vmem>>, vector<384x128xf32>
    %c0_103 = arith.constant 0 : index
    %c0_104 = arith.constant 0 : index
    %75 = vector.load %arg4[%c0_103, %c0_104] : memref<1x128xf32, #tpu.memory_space<vmem>>, vector<1x128xf32>
    %76 = vector.broadcast %75 : vector<1x128xf32> to vector<384x128xf32>
    %77 = arith.mulf %74, %76 : vector<384x128xf32>
    %c0_105 = arith.constant 0 : index
    %c0_106 = arith.constant 0 : index
    %78 = vector.load %arg5[%c0_105, %c0_106] : memref<1x128xf32, #tpu.memory_space<vmem>>, vector<1x128xf32>
    %79 = vector.broadcast %78 : vector<1x128xf32> to vector<384x128xf32>
    %80 = arith.addf %77, %79 : vector<384x128xf32>
    %cst_107 = arith.constant 0.000000e+00 : f32
    %81 = vector.broadcast %cst_107 : f32 to vector<384x128xf32>
    %82 = arith.maximumf %80, %81 : vector<384x128xf32>
    %83 = vector.shape_cast %82 : vector<384x128xf32> to vector<16x24x128xf32>
    %84 = vector.extract_strided_slice %83 {offsets = [0, 0, 0], sizes = [16, 16, 128], strides = [1, 1, 1]} : vector<16x24x128xf32> to vector<16x16x128xf32>
    %85 = arith.truncf %84 : vector<16x16x128xf32> to vector<16x16x128xbf16>
    %c0_108 = arith.constant 0 : index
    %c0_109 = arith.constant 0 : index
    %c0_110 = arith.constant 0 : index
    %c0_111 = arith.constant 0 : index
    %86 = vector.load %arg6[%c0_108, %c0_109, %c0_110, %c0_111] : memref<1x16x16x128xbf16, #tpu.memory_space<vmem>>, vector<1x16x16x128xbf16>
    %87 = vector.shape_cast %86 : vector<1x16x16x128xbf16> to vector<16x16x128xbf16>
    %88 = vector.shape_cast %85 : vector<16x16x128xbf16> to vector<1x16x16x128xbf16>
    tpu.vector_store %arg6[%c0_108, %c0_109, %c0_110, %c0_111], %88 {strides = array<i32>} : memref<1x16x16x128xbf16, #tpu.memory_space<vmem>>, vector<1x16x16x128xbf16>,
    return
  }
  func.func @transform_0(%arg0: i32, %arg1: i32) -> (i32, i32, i32) {
    %c0_i32 = arith.constant 0 : i32
    %c0_i32_0 = arith.constant 0 : i32
    %c0_i32_1 = arith.constant 0 : i32
    return %arg0, %c0_i32, %c0_i32_0 : i32, i32, i32
  }
  func.func @transform_1(%arg0: i32, %arg1: i32) -> (i32, i32, i32, i32) {
    %c0_i32 = arith.constant 0 : i32
    %c0_i32_0 = arith.constant 0 : i32
    %c0_i32_1 = arith.constant 0 : i32
    %c0_i32_2 = arith.constant 0 : i32
    return %c0_i32, %c0_i32_0, %c0_i32_1, %arg1 : i32, i32, i32, i32
  }
  func.func @transform_2(%arg0: i32, %arg1: i32) -> (i32, i32) {
    %c0_i32 = arith.constant 0 : i32
    %c0_i32_0 = arith.constant 0 : i32
    return %c0_i32, %arg1 : i32, i32
  }
  func.func @transform_3(%arg0: i32, %arg1: i32) -> (i32, i32) {
    %c0_i32 = arith.constant 0 : i32
    %c0_i32_0 = arith.constant 0 : i32
    return %c0_i32, %arg1 : i32, i32
  }
  func.func @transform_4(%arg0: i32, %arg1: i32) -> (i32, i32, i32, i32) {
    %c0_i32 = arith.constant 0 : i32
    %c0_i32_0 = arith.constant 0 : i32
    %c0_i32_1 = arith.constant 0 : i32
    return %arg0, %c0_i32, %c0_i32_0, %arg1 : i32, i32, i32, i32
  }
}

</mosaic_0001>

<bundles_post_ra>
// kernel: tpu_custom_call.1
= control target key start
LH: loop header
LB: loop body
LE: loop exit
PB: predicated region body
PF: predicated region fallthrough
CT: control target
= control target key end

     0   :  { %9 = vsyncpa [#allocation4], 0  ;;  %s9986_s0 = inlined_call_operand.vmem [shape: bf16[2,456,4], index: 0, kind: input, shape index: {}]   ;;  %s9987_s1 = inlined_call_operand.vmem [shape: bf16[3,3,4,128], index: 1, kind: input, shape index: {}]   ;;  %s9988_s2 = inlined_call_operand.vmem [shape: f32[1,128], index: 2, kind: input, shape index: {}]   ;;  %s9989_s3 = inlined_call_operand.vmem [shape: f32[1,128], index: 3, kind: input, shape index: {}]   ;;  %s9990_s4 = inlined_call_operand.hbm [shape: bf16[2,16,16,128], index: 4, kind: output, shape index: {}]  }
   0x1   :  { %11 = vsyncpa [#allocation4 + $0x1], 0  ;;  %s9088_s15 = smov 0   ;;  %s9090_s16 = smov 0  }
   0x2   :  { %s9092_s17 = smov 0   ;;  %s9094_s18 = smov 0  }
   0x3   :  { %s9096_s19 = smov 0   ;;  %s9098_s20 = smov 0  }
   0x4 LB: > { %s7020_s21 = sadd.s32 4294967295, %s9058_s20   ;;  %s7021_s22 = sadd.s32 4294967294, %s9058_s20   ;;  %s9058_s20 = sphi %s9098_s20, %s17_s20   ;;  %s9054_s19 = sphi %s9096_s19, %s9997_s19   ;;  %s9050_s18 = sphi %s9094_s18, %s9996_s18   ;;  %s9046_s17 = sphi %s9092_s17, %s9995_s17   ;;  %s9042_s16 = sphi %s9090_s16, %s9994_s16   ;;  %s9038_s15 = sphi %s9088_s15, %s9993_s15  }
   0x5   : > { %s29_s23 = sadd.s32 1, %s9054_s19  ;;  %s142_s24 = sadd.s32 1, %s9046_s17 }
   0x6   : > { %p31_p0 = scmp.ge.s32.totalorder %s29_s23, 2  ;;  %p152_p1 = scmp.ne.s32.totalorder %s9046_s17, %s9042_s16 }
   0x7   : > { %p153_p2 = scmp.eq.s32.totalorder %s7020_s21, 1  ;;  %p158_p3 = scmp.ne.s32.totalorder %s9042_s16, %s9038_s15 }
   0x8   : > { %s9999_s23 = smov (%p31_p0, %s29_s23), 0  ;;  %p159_p5 = scmp.eq.s32.totalorder %s7021_s22, 1 }
   0x9   : > { %p9128_p4 = por %p153_p2, %p152_p1  ;;  %s137_s26 = ssub.s32 %s9054_s19, %s9999_s23 }
   0xa   : > { %p7027_p6 = scmp.ge.s32.totalorder %s9058_s20, 1  ;;  %p140_p7 = scmp.eq.s32.totalorder %s137_s26, 0 }
   0xb   : > { %p9135_p8 = por %p159_p5, %p158_p3  ;;  %p204_p9 = scmp.lt.s32.totalorder %s9058_s20, 3 }
   0xc   : > { %s9141_s28 = scalar_select %p140_p7, %s9046_s17, %s142_s24  }
   0xd   : > { %p205_p10 = pnand %p7027_p6, %p204_p9 }
   0xe   : > { %v400_v0 = vld [vmem:[%s9987_s1] sm:$0x3] (!%p205_p10)  ;;  %vm594_vm0 = vcmask (!%p205_p10), 1041408   ;;  %p240_p11 = scmp.lt.s32.totalorder (!%p205_p10), %s9050_s18, 1  ;;  %v7227_v2 = vld [vmem:[%s9987_s1 + $0x8] sm:$0x3] (!%p205_p10) }
   0xf   : > { %208 = sbr.rel (%p205_p10) target bundleno = 701 (0x2bd), region = 36  ;;  %8688 = vmatprep.subr.msk.bf16.mxu1 (!%p205_p10), %vm594_vm0, %v400_v0  ;;  %v596_v1 = vsel (!%p205_p10), %vm594_vm0, %v400_v0, 0  ;;  %v7078_v3 = vld [vmem:[%s9987_s1 + $0x2] sm:$0x3] (!%p205_p10)  ;;  %8692 = vmatprep.subr.msk.bf16.mxu0 (!%p205_p10), %vm594_vm0, %v7227_v2  ;;  %v9158_v4 = vsel (!%p205_p10), %vm594_vm0, %v7227_v2, 0  ;;  %vm521_vm1 = vcmask (!%p205_p10), 31744  }
  0x10   : > { %7869 = vmatpush3.bf16.msra.mxu1 (!%p205_p10), %v596_v1  ;;  %v7277_v5 = vld [vmem:[%s9987_s1 + $0xa] sm:$0x3] (!%p205_p10)  ;;  %8069 = vmatpush3.bf16.msra.mxu0 (!%p205_p10), %v9158_v4  ;;  %v9175_v7 = vld [vmem:[%s9987_s1 + $0x4] sm:$0x3] (!%p205_p10)  ;;  %v1411_v9 = vsel (!%p205_p10), %vm594_vm0, %v7078_v3, 0  ;;  %vm1956_vm3 = vcmask (!%p205_p10), 1046528  }
  0x11   : > { %8689 = vmatprep.subr.msk.bf16.mxu1 (!%p205_p10), %vm594_vm0, %v7078_v3  ;;  %8694 = vmatprep.subr.msk.bf16.mxu0 (!%p205_p10), %vm594_vm0, %v7277_v5  ;;  %vm1141_vm2 = vsmask.f32 (!%p205_p10), 7424  ;;  %v4174_v18 = vsel (!%p205_p10), %vm594_vm0, %v7277_v5, 0  ;;  %v9196_v31 = vld [vmem:[%s9987_s1 + $0xc] sm:$0x3] (!%p205_p10)  ;;  %s237_s22 = sand.u32 (!%p205_p10), 1, %s9042_s16  }
  0x12   : > { %s7028_s24 = sshll.u32 (!%p205_p10), %s237_s22, 7  ;;  %s7547_s29 = sshll.u32 (!%p205_p10), %s9050_s18, 11 }
  0x13   : > { %s9849_s26 = scalar_lea.vmem (!%p205_p10), [#allocation3], %s7028_s24  ;;  %s9933_s7 = scalar_lea.hbm (!%p205_p10), %s9990_s4, %s7547_s29 }
  0x14   : > { %s6909_s30 = sshll.u32 (!%p205_p10), %s9849_s26, 4  ;;  %s9940_s8 = scalar_lea.sflag (!%p205_p10), [#allocation4], %s237_s22  ;;  %s9935_s30 = int_to_ptr.vmem [resolvable:$true] %s6909_s30 }
  0x16   : > { %s241_s9 = scalar_select %p240_p11, %s9050_s18, 1 }
  0x17   : > { %s9060_s18 = smov [#allocation3]  }
  0x18   : > { %s8698_s12 = smul.u32 228, %s241_s9  ;;  %s8980_s9 = scalar_lea.vmem %s9935_s30, 2048 }
  0x19   : > { %p8981_p12 = scmp.ne.s32.totalorder %s9935_s30, %s8980_s9  ;;  %s8984_s10 = sshll.u32 %s9060_s18, 4  ;;  %s8985_s10 = int_to_ptr.vmem [resolvable:$false] %s8984_s10 }
  0x1a   : > { %s9169_s21 = scalar_lea.vmem %s9986_s0, %s8698_s12  ;;  %s8986_s11 = scalar_lea.vmem %s8985_s10, 4096 }
  0x1b   : > { %v8756_v6 = vld [vmem:[%s9169_s21] sm:$0xff]   ;;  %v8757_v8 = vld [vmem:[%s9169_s21 + $0x8] sm:$0xff]   ;;  %v8759_v11 = vld [vmem:[%s9169_s21 + $0x14] sm:$0xff]   ;;  %p8982_p13 = pnand %p8981_p12, %p9128_p4  ;;  %p8987_p1 = scmp.lt.s32.totalorder %s9935_s30, %s8985_s10 }
  0x1c   : > { %7870 = vmatprep.mubr.msk.bf16.mxu1 %vm521_vm1, %v8756_v6  ;;  %v8758_v10 = vld [vmem:[%s9169_s21 + $0xc] sm:$0xff]   ;;  %v3246_v15 = vshll.u32 %v8759_v11, 16  ;;  %v3250_v16 = vshrl.u32 %v8759_v11, 16  ;;  %v8761_v17 = vld [vmem:[%s9169_s21 + $0x1c] sm:$0xff]   ;;  %v8763_v22 = vld [vmem:[%s9169_s21 + $0x24] sm:$0xff]   ;;  %p8988_p2 = scmp.lt.s32.totalorder %s8986_s11, %s8980_s9 }
  0x1d   : > { %7871 = vmatmul.mubr.msk.bf16.vlgmr.msra.gmra.mrb[0].mxu1 %vm521_vm1, %v8757_v8  ;;  %v8760_v12 = vld [vmem:[%s9169_s21 + $0x10] sm:$0xff]   ;;  %v3239_v13 = vshrl.u32 %v8758_v10, 16  ;;  %v3241_v14 = vshll.u32 %v8758_v10, 16  ;;  %v8762_v21 = vld [vmem:[%s9169_s21 + $0x18] sm:$0xff]   ;;  %v3254_v23 = vshll.u32 %v8761_v17, 16  ;;  %v3258_v24 = vshrl.u32 %v8761_v17, 16  ;;  %p8983_p0 = pneg %p8982_p13 }
  0x1e   : > { %7919 = vmatpush3.bf16.msra.mxu1 %v1411_v9  ;;  %7874 = vmatprep.mubr.msk.bf16.mxu1 %vm521_vm1, %v8760_v12  ;;  %v3248_v20 = vrot.slane %v3246_v15, 1  ;;  %v3262_v27 = vshll.u32 %v8763_v22, 16  ;;  %v8764_v28 = vld [vmem:[%s9169_s21 + $0x20] sm:$0xff]   ;;  %v8765_v30 = vld [vmem:[%s9169_s21 + $0x2c] sm:$0xff]   ;;  %v3266_v34 = vshrl.u32 %v8763_v22, 16  ;;  %v8767_v38 = vld [vmem:[%s9169_s21 + $0x34] sm:$0xff]   ;;  %p8989_p3 = por %p8988_p2, %p8987_p1 }
  0x1f   : > { %8690 = vmatprep.subr.msk.bf16.mxu1 %vm594_vm0, %v9175_v7  ;;  %v3243_v19 = vrot.slane %v3241_v14, 1  ;;  %v3256_v29 = vrot.slane %v3254_v23, 1  ;;  %v3270_v37 = vshll.u32 %v8765_v30, 16  ;;  %v3274_v39 = vshrl.u32 %v8765_v30, 16  ;;  %v8766_v43 = vld [vmem:[%s9169_s21 + $0x28] sm:$0xff]   ;;  %v8768_v45 = vld [vmem:[%s9169_s21 + $0x30] sm:$0xff]  }
  0x20   : > { %v3252_v26 = vor.u32 %v3250_v16, %v3248_v20  ;;  %v3264_v33 = vrot.slane %v3262_v27, 1  ;;  %v3278_v44 = vshll.u32 %v8767_v38, 16  ;;  %v8769_v46 = vld [vmem:[%s9169_s21 + $0x3c] sm:$0xff]   ;;  %v8771_v50 = vld [vmem:[%s9169_s21 + $0x44] sm:$0xff]   ;;  %v3282_v52 = vshrl.u32 %v8767_v38, 16  ;;  %v8773_v56 = vld [vmem:[%s9169_s21 + $0x4c] sm:$0xff]   ;;  %p8990_p5 = pnand %p8989_p3, %p8983_p0 }
  0x21   : > { %v3244_v25 = vor.u32 %v3243_v19, %v3239_v13  ;;  %v3260_v36 = vor.u32 %v3258_v24, %v3256_v29  ;;  %v3272_v42 = vrot.slane %v3270_v37, 1  ;;  %v3286_v49 = vshll.u32 %v8769_v46, 16  ;;  %v8775_v59 = vld [vmem:[%s9169_s21 + $0x54] sm:$0xff]   ;;  %v8772_v63 = vld [vmem:[%s9169_s21 + $0x40] sm:$0xff]   ;;  %v8774_v11 = vld [vmem:[%s9169_s21 + $0x48] sm:$0xff]  }
  0x22   : > { %v3257_v35 = vsel %vm1141_vm2, %v3252_v26, %v3256_v29  ;;  %v3268_v41 = vor.u32 %v3266_v34, %v3264_v33  ;;  %v3280_v48 = vrot.slane %v3278_v44, 1  ;;  %v3290_v54 = vshrl.u32 %v8769_v46, 16  ;;  %v8770_v60 = vld [vmem:[%s9169_s21 + $0x38] sm:$0xff]   ;;  %v8779_v14 = vld [vmem:[%s9169_s21 + $0x64] sm:$0xff]   ;;  %v8776_v15 = vld [vmem:[%s9169_s21 + $0x50] sm:$0xff]  }
  0x23   : > { %v3249_v32 = vsel %vm1141_vm2, %v3244_v25, %v3248_v20  ;;  %v3265_v40 = vsel %vm1141_vm2, %v3260_v36, %v3264_v33  ;;  %v3276_v47 = vor.u32 %v3274_v39, %v3272_v42  ;;  %v3294_v55 = vshll.u32 %v8771_v50, 16  ;;  %v8777_v9 = vld [vmem:[%s9169_s21 + $0x5c] sm:$0xff]   ;;  %v8781_v23 = vld [vmem:[%s9169_s21 + $0x6c] sm:$0xff]  }
  0x24   : > { %8070 = vmatprep.mubr.msk.bf16.mxu0 %vm521_vm1, %v3249_v32  ;;  %v3273_v51 = vsel %vm1141_vm2, %v3268_v41, %v3272_v42  ;;  %v3288_v57 = vrot.slane %v3286_v49, 1  ;;  %v3284_v58 = vor.u32 %v3282_v52, %v3280_v48  ;;  %v3302_v0 = vshll.u32 %v8773_v56, 16  ;;  %v8778_v25 = vld [vmem:[%s9169_s21 + $0x58] sm:$0xff]   ;;  %v8783_v33 = vld [vmem:[%s9169_s21 + $0xc] sm:$0xfe]   ;;  %v8789_v49 = vld [vmem:[%s9169_s21 + $0x80] sm:$0xff]  }
  0x25   : > { %7875 = vmatmul.mubr.msk.bf16.gmra.mrb[4].mxu1 %vm521_vm1, %v8762_v21  ;;  %8071 = vmatmul.mubr.msk.bf16.vlgmr.msra.gmra.mrb[0].mxu0 %vm521_vm1, %v3257_v35  ;;  %v3281_v53 = vsel %vm1141_vm2, %v3276_v47, %v3280_v48  ;;  %v3296_v62 = vrot.slane %v3294_v55, 1  ;;  %v3298_v2 = vshrl.u32 %v8771_v50, 16  ;;  %v3306_v3 = vshrl.u32 %v8773_v56, 16  ;;  %v8784_v35 = vld [vmem:[%s9169_s21 + $0x14] sm:$0xff]   ;;  %v8782_v38 = vld [vmem:[%s9169_s21 + $0x68] sm:$0xff]  }
  0x26   : > { %7878 = vmatprep.mubr.msk.bf16.mxu1 %vm521_vm1, %v8764_v28  ;;  %8119 = vmatpush3.bf16.msra.mxu0 %v4174_v18  ;;  %v3292_v61 = vor.u32 %v3290_v54, %v3288_v57  ;;  %v3289_v1 = vsel %vm1141_vm2, %v3284_v58, %v3288_v57  ;;  %v3310_v5 = vshll.u32 %v8775_v59, 16  ;;  %v3304_v8 = vrot.slane %v3302_v0, 1  ;;  %v8780_v28 = vld [vmem:[%s9169_s21 + $0x60] sm:$0xff]   ;;  %v8785_v41 = vld [vmem:[%s9169_s21 + $0x70] sm:$0xff]   ;;  %v8787_v47 = vld [vmem:[%s9169_s21 + $0x78] sm:$0xff]  }
  0x27   : > { %8074 = vmatprep.mubr.msk.bf16.mxu0 %vm521_vm1, %v3265_v40  ;;  %8695 = vmatprep.subr.msk.bf16.mxu0 %vm594_vm0, %v9196_v31  ;;  %v3300_v10 = vor.u32 %v3298_v2, %v3296_v62  ;;  %v3318_v16 = vshll.u32 %v8777_v9, 16  ;;  %v3314_v18 = vshrl.u32 %v8775_v59, 16  ;;  %v3322_v20 = vshrl.u32 %v8777_v9, 16  ;;  %v8792_v54 = vld [vmem:[%s9169_s21 + $0x34] sm:$0xff]   ;;  %v8791_v56 = vld [vmem:[%s9169_s21 + $0x88] sm:$0xff]   ;;  %v8794_v59 = vld [vmem:[%s9169_s21 + $0x3c] sm:$0xff]  }
  0x28   : > { %v3297_v6 = vsel %vm1141_vm2, %v3292_v61, %v3296_v62  ;;  %v3308_v12 = vor.u32 %v3306_v3, %v3304_v8  ;;  %v3312_v13 = vrot.slane %v3310_v5, 1  ;;  %v3326_v21 = vshll.u32 %v8779_v14, 16  ;;  %v8796_v61 = vld [vmem:[%s9169_s21 + $0x44] sm:$0xff]   ;;  %v8798_v5 = vld [vmem:[%s9169_s21 + $0x4c] sm:$0xff]  }
  0x29   : > { %v3305_v17 = vsel %vm1141_vm2, %v3300_v10, %v3304_v8  ;;  %v3320_v22 = vrot.slane %v3318_v16, 1  ;;  %v3330_v29 = vshrl.u32 %v8779_v14, 16  ;;  %v3334_v30 = vshll.u32 %v8781_v23, 16  ;;  %v8805_v2 = vld [vmem:[%s9169_s21] sm:$0xff]   ;;  %v8800_v8 = vld [vmem:[%s9169_s21 + $0x54] sm:$0xff]   ;;  %v8806_v9 = vld [vmem:[%s9169_s21 + $0x8] sm:$0xff]  }
  0x2a   : > { %v3313_v19 = vsel %vm1141_vm2, %v3308_v12, %v3312_v13  ;;  %v3316_v24 = vor.u32 %v3314_v18, %v3312_v13  ;;  %v3328_v27 = vrot.slane %v3326_v21, 1  ;;  %v4052_v39 = vrot.slane %v8783_v33, 1  ;;  %v8799_v12 = vld [vmem:[%s9169_s21 + $0xa8] sm:$0xff]   ;;  %v8801_v14 = vld [vmem:[%s9169_s21 + $0xb0] sm:$0xff]  }
  0x2b   : > { %v3324_v26 = vor.u32 %v3322_v20, %v3320_v22  ;;  %v9250_v37 = vrot.slane %v3334_v30, 1  ;;  %v4053_v40 = vrot.slane %v8784_v35, 1  ;;  %v4788_v52 = vsel %vm594_vm0, %v9196_v31, 0  ;;  %v8793_v31 = vld [vmem:[%s9169_s21 + $0x90] sm:$0xff]   ;;  %v8804_v20 = vld [vmem:[%s9169_s21 + $0x64] sm:$0xff]  }
  0x2c   : > { %v3321_v32 = vsel %vm1141_vm2, %v3316_v24, %v3320_v22  ;;  %v3332_v36 = vor.u32 %v3330_v29, %v3328_v27  ;;  %v4061_v57 = vrot.slane %v8792_v54, 1  ;;  %v4063_v62 = vrot.slane %v8794_v59, 1  ;;  %v8808_v22 = vld [vmem:[%s9169_s21 + $0x10] sm:$0xff]  }
  0x2d   : > { %7879 = vmatmul.mubr.msk.bf16.gmra.mrb[8].mxu1 %vm521_vm1, %v8766_v43  ;;  %8075 = vmatmul.mubr.msk.bf16.gmra.mrb[4].mxu0 %vm521_vm1, %v3273_v51  ;;  %v3329_v34 = vsel %vm1141_vm2, %v3324_v26, %v3328_v27  ;;  %v8786_v43 = vld [vmem:[%s9169_s21 + $0x1c] sm:$0xff]   ;;  %v4054_v44 = vsel %vm1956_vm3, %v4052_v39, %v4053_v40  ;;  %v8790_v51 = vld [vmem:[%s9169_s21 + $0x2c] sm:$0xff]   ;;  %v4065_v0 = vrot.slane %v8796_v61, 1  ;;  %v1145_v10 = vshll.u32 %v8805_v2, 16 }
  0x2e   : > { %7882 = vmatprep.mubr.msk.bf16.mxu1 %vm521_vm1, %v8768_v45  ;;  %8078 = vmatprep.mubr.msk.bf16.mxu0 %vm521_vm1, %v3281_v53  ;;  %v3337_v42 = vsel %vm1141_vm2, %v3332_v36, %v9250_v37  ;;  %v8788_v45 = vld [vmem:[%s9169_s21 + $0x24] sm:$0xff]   ;;  %v4055_v46 = vrot.slane %v8786_v43, 1  ;;  %v4059_v55 = vrot.slane %v8790_v51, 1  ;;  %v4064_v3 = vsel %vm1956_vm3, %v4061_v57, %v4063_v62  ;;  %v8803_v27 = vld [vmem:[%s9169_s21 + $0xb8] sm:$0xff]   ;;  %v8807_v33 = vld [vmem:[%s9169_s21 + $0x6c] sm:$0xff]  }
  0x2f   : > { %v4057_v48 = vrot.slane %v8788_v45, 1  ;;  %v4069_v13 = vrot.slane %v8800_v8, 1  ;;  %v1143_v16 = vshrl.u32 %v8805_v2, 16  ;;  %v1150_v18 = vshll.u32 %v8806_v9, 16  ;;  %v8815_v8 = vld [vmem:[%s9169_s21 + $0x8c] sm:$0xff]  }
  0x30   : > { %v4056_v50 = vsel %vm1956_vm3, %v4053_v40, %v4055_v46  ;;  %v4073_v29 = vrot.slane %v8804_v20, 1  ;;  %v1158_v30 = vshll.u32 %v8808_v22, 16  ;;  %v1162_v36 = vshrl.u32 %v8808_v22, 16  ;;  %v8812_v40 = vld [vmem:[%s9169_s21 + $0x20] sm:$0xff]  }
  0x31   : > { %v4058_v53 = vsel %vm1956_vm3, %v4055_v46, %v4057_v48  ;;  %v4060_v58 = vsel %vm1956_vm3, %v4057_v48, %v4059_v55  ;;  %v1152_v24 = vrot.slane %v1150_v18, 1  ;;  %v8814_v46 = vld [vmem:[%s9169_s21 + $0x28] sm:$0xff]   ;;  %v2079_v51 = vsel %vm594_vm0, %v9175_v7, 0 }
  0x32   : > { %v1178_v54 = vshrl.u32 %v8812_v40, 16  ;;  %v1186_v2 = vshrl.u32 %v8814_v46, 16  ;;  %v4083_v20 = vrot.slane %v8815_v8, 1 }
  0x35   : > { %7883 = vmatmul.mubr.msk.bf16.gmra.mrb[12].mxu1 %vm521_vm1, %v8770_v60  ;;  %8079 = vmatmul.mubr.msk.bf16.gmra.mrb[8].mxu0 %vm521_vm1, %v3289_v1  ;;  %v4062_v60 = vsel %vm1956_vm3, %v4059_v55, %v4061_v57  ;;  %v8797_v1 = vld [vmem:[%s9169_s21 + $0xa0] sm:$0xff]   ;;  %v1182_v55 = vshll.u32 %v8814_v46, 16  ;;  %v8823_v46 = vld [vmem:[%s9169_s21 + $0xac] sm:$0xff]  }
  0x36   : > { %7886 = vmatprep.mubr.msk.bf16.mxu1 %vm521_vm1, %v8772_v63  ;;  %8082 = vmatprep.mubr.msk.bf16.mxu0 %vm521_vm1, %v3297_v6  ;;  %v8795_v63 = vld [vmem:[%s9169_s21 + $0x98] sm:$0xff]   ;;  %v4066_v6 = vsel %vm1956_vm3, %v4063_v62, %v4065_v0 }
  0x37   : > { %v8811_v57 = vld [vmem:[%s9169_s21 + $0x7c] sm:$0xff]   ;;  %v1184_v62 = vrot.slane %v1182_v55, 1 }
  0x38   : > { %v8828_v55 = vld [vmem:[%s9169_s21 + $0x60] sm:$0xff]  }
  0x3d   : > { %7887 = vmatmul.mubr.msk.bf16.gmra.mrb[16].mxu1 %vm521_vm1, %v8774_v11  ;;  %8083 = vmatmul.mubr.msk.bf16.gmra.mrb[12].mxu0 %vm521_vm1, %v3305_v17  ;;  %v4067_v11 = vrot.slane %v8798_v5, 1  ;;  %v1147_v17 = vrot.slane %v1145_v10, 1 }
  0x3e   : > { %7890 = vmatprep.mubr.msk.bf16.mxu1 %vm521_vm1, %v8776_v15  ;;  %8086 = vmatprep.mubr.msk.bf16.mxu0 %vm521_vm1, %v3313_v19  ;;  %v8802_v15 = vld [vmem:[%s9169_s21 + $0x5c] sm:$0xff]  }
  0x3f   : > { %v4068_v19 = vsel %vm1956_vm3, %v4065_v0, %v4067_v11  ;;  %v4070_v21 = vsel %vm1956_vm3, %v4067_v11, %v4069_v13  ;;  %v1148_v23 = vor.u32 %v1147_v17, %v1143_v16  ;;  %v4071_v26 = vrot.slane %v8802_v15, 1  ;;  %v8820_v15 = vld [vmem:[%s9169_s21 + $0x40] sm:$0xff]  }
  0x40   : > { %v4079_v0 = vrot.slane %v8811_v57, 1  ;;  %v1188_v16 = vor.u32 %v1186_v2, %v1184_v62  ;;  %v1206_v22 = vshll.u32 %v8820_v15, 16 }
  0x41   : > { %v1153_v35 = vsel %vm1141_vm2, %v1148_v23, %v1152_v24  ;;  %v4072_v39 = vsel %vm1956_vm3, %v4069_v13, %v4071_v26 }
  0x45   : > { %7891 = vmatmul.mubr.msk.bf16.gmra.mrb[20].mxu1 %vm521_vm1, %v8778_v25  ;;  %8087 = vmatmul.mubr.msk.bf16.gmra.mrb[16].mxu0 %vm521_vm1, %v3321_v32  ;;  %v8810_v25 = vld [vmem:[%s9169_s21 + $0x18] sm:$0xff]   ;;  %v1154_v32 = vshrl.u32 %v8806_v9, 16 }
  0x46   : > { %7894 = vmatprep.mubr.msk.bf16.mxu1 %vm521_vm1, %v8780_v28  ;;  %8090 = vmatprep.mubr.msk.bf16.mxu0 %vm521_vm1, %v3329_v34  ;;  %v9313_v28 = vld [vmem:[%s9987_s1 + $0xe] sm:$0x3]  ;;  %v8809_v34 = vld [vmem:[%s9169_s21 + $0x74] sm:$0xff]  }
  0x47   : > { %v1156_v43 = vor.u32 %v1154_v32, %v1152_v24  ;;  %v4077_v48 = vrot.slane %v8809_v34, 1  ;;  %v8819_v24 = vld [vmem:[%s9169_s21 + $0x9c] sm:$0xff]  }
  0x49   : > { %v4080_v11 = vsel %vm1956_vm3, %v4077_v48, %v4079_v0 }
  0x4d   : > { %7895 = vmatmul.mubr.msk.bf16.gmra.mrb[24].mxu1 %vm521_vm1, %v8782_v38  ;;  %8091 = vmatmul.mubr.msk.bf16.gmra.mrb[20].mxu0 %vm521_vm1, %v3337_v42  ;;  %v1166_v38 = vshll.u32 %v8810_v25, 16  ;;  %v1160_v42 = vrot.slane %v1158_v30, 1  ;;  %v9360_v30 = vld [vmem:[%s9987_s1 + $0x6] sm:$0x3] }
  0x4e   : > { %7898 = vmatprep.mubr.msk.bf16.mxu1 %vm521_vm1, %v8785_v41  ;;  %8120 = vmatprep.mubr.msk.bf16.mxu0 %vm521_vm1, %v4054_v44  ;;  %v4074_v41 = vsel %vm1956_vm3, %v4071_v26, %v4073_v29 }
  0x4f   : > { %v1164_v44 = vor.u32 %v1162_v36, %v1160_v42  ;;  %v1168_v45 = vrot.slane %v1166_v38, 1  ;;  %v8824_v36 = vld [vmem:[%s9169_s21 + $0x50] sm:$0xff]  }
  0x55   : > { %7899 = vmatmul.mubr.msk.bf16.gmra.mrb[28].mxu1 %vm521_vm1, %v8787_v47  ;;  %8121 = vmatmul.mubr.msk.bf16.vlgmr.msra.gmra.mrb[0].mxu0 %vm521_vm1, %v4056_v50  ;;  %v4075_v47 = vrot.slane %v8807_v33, 1  ;;  %v1161_v50 = vsel %vm1141_vm2, %v1156_v43, %v1160_v42  ;;  %v8821_v33 = vld [vmem:[%s9169_s21 + $0xa4] sm:$0xff]   ;;  %v4087_v42 = vrot.slane %v8819_v24, 1 }
  0x56   : > { %7902 = vmatprep.mubr.msk.bf16.mxu1 %vm521_vm1, %v8789_v49  ;;  %8169 = vmatpush3.bf16.msra.mxu0 %v4788_v52  ;;  %v1174_v49 = vshll.u32 %v8812_v40, 16  ;;  %v1170_v52 = vshrl.u32 %v8810_v25, 16  ;;  %v4089_v43 = vrot.slane %v8821_v33, 1  ;;  %v8838_v33 = vld [vmem:[%s9169_s21 + $0x88] sm:$0xff]  }
  0x57   : > { %8124 = vmatprep.mubr.msk.bf16.mxu0 %vm521_vm1, %v4058_v53  ;;  %8696 = vmatprep.subr.msk.bf16.mxu0 %vm594_vm0, %v9313_v28  ;;  %v1169_v53 = vsel %vm1141_vm2, %v1164_v44, %v1168_v45  ;;  %v1222_v44 = vshll.u32 %v8824_v36, 16 }
  0x58   : > { %v1176_v59 = vrot.slane %v1174_v49, 1  ;;  %v1172_v7 = vor.u32 %v1170_v52, %v1168_v45  ;;  %v1226_v49 = vshrl.u32 %v8824_v36, 16  ;;  %v8825_v52 = vld [vmem:[%s9169_s21 + $0xb4] sm:$0xff]  }
  0x5a   : > { %v1180_v61 = vor.u32 %v1178_v54, %v1176_v59  ;;  %v1177_v5 = vsel %vm1141_vm2, %v1172_v7, %v1176_v59  ;;  %v1224_v54 = vrot.slane %v1222_v44, 1  ;;  %v4091_v59 = vrot.slane %v8823_v46, 1 }
  0x5b   : > { %v1238_v7 = vshll.u32 %v8828_v55, 16 }
  0x5c   : > { %v1228_v57 = vor.u32 %v1226_v49, %v1224_v54  ;;  %v8842_v49 = vld [vmem:[%s9169_s21 + $0x98] sm:$0xff]  }
  0x5d   : > { %7903 = vmatmul.mubr.msk.bf16.gmra.mrb[32].mxu1 %vm521_vm1, %v8791_v56  ;;  %8125 = vmatmul.mubr.msk.bf16.gmra.mrb[4].mxu0 %vm521_vm1, %v4060_v58  ;;  %v4076_v56 = vsel %vm1956_vm3, %v4073_v29, %v4075_v47  ;;  %v4078_v58 = vsel %vm1956_vm3, %v4075_v47, %v4077_v48  ;;  %v1240_v8 = vrot.slane %v1238_v7, 1  ;;  %v9430_v7 = vld [vmem:[%s9987_s1 + $0x10] sm:$0x3] }
  0x5e   : > { %7906 = vmatprep.mubr.msk.bf16.mxu1 %vm521_vm1, %v8793_v31  ;;  %8128 = vmatprep.mubr.msk.bf16.mxu0 %vm521_vm1, %v4062_v60  ;;  %v8813_v31 = vld [vmem:[%s9169_s21 + $0x84] sm:$0xff]   ;;  %v8816_v60 = vld [vmem:[%s9169_s21 + $0x30] sm:$0xff]  }
  0x5f   : > { %v1194_v9 = vshrl.u32 %v8816_v60, 16 }
  0x65   : > { %7907 = vmatmul.mubr.msk.bf16.gmra.mrb[36].mxu1 %vm521_vm1, %v8795_v63  ;;  %8129 = vmatmul.mubr.msk.bf16.gmra.mrb[8].mxu0 %vm521_vm1, %v4064_v3  ;;  %v8818_v63 = vld [vmem:[%s9169_s21 + $0x38] sm:$0xff]   ;;  %v1190_v3 = vshll.u32 %v8816_v60, 16  ;;  %v4093_v60 = vrot.slane %v8825_v52, 1 }
  0x66   : > { %7910 = vmatprep.mubr.msk.bf16.mxu1 %vm521_vm1, %v8797_v1  ;;  %8132 = vmatprep.mubr.msk.bf16.mxu0 %vm521_vm1, %v4066_v6  ;;  %v4081_v1 = vrot.slane %v8813_v31, 1  ;;  %v1185_v6 = vsel %vm1141_vm2, %v1180_v61, %v1184_v62  ;;  %v1198_v10 = vshll.u32 %v8818_v63, 16  ;;  %v1202_v25 = vshrl.u32 %v8818_v63, 16  ;;  %v8827_v62 = vld [vmem:[%s9169_s21 + $0xbc] sm:$0xff]  }
  0x67   : > { %v1192_v13 = vrot.slane %v1190_v3, 1  ;;  %v4092_v3 = vsel %vm1956_vm3, %v4089_v43, %v4091_v59 }
  0x68   : > { %v1200_v18 = vrot.slane %v1198_v10, 1  ;;  %v4084_v32 = vsel %vm1956_vm3, %v4081_v1, %v4083_v20 }
  0x69   : > { %v1196_v17 = vor.u32 %v1194_v9, %v1192_v13  ;;  %v1193_v23 = vsel %vm1141_vm2, %v1188_v16, %v1192_v13  ;;  %v8832_v9 = vld [vmem:[%s9169_s21 + $0x70] sm:$0xff]   ;;  %v8834_v13 = vld [vmem:[%s9169_s21 + $0x78] sm:$0xff]  }
  0x6a   : > { %v1204_v38 = vor.u32 %v1202_v25, %v1200_v18  ;;  %v1254_v16 = vshll.u32 %v8832_v9, 16 }
  0x6b   : > { %v1201_v26 = vsel %vm1141_vm2, %v1196_v17, %v1200_v18  ;;  %v8831_v18 = vld [vmem:[%s9169_s21 + $0xcc] ss:$0 sps:$4 sm:$0x11]  }
  0x6c   : > { %v1256_v25 = vrot.slane %v1254_v16, 1  ;;  %v8843_v16 = vld [vmem:[%s9169_s21 + $0x40] sm:$0xff]  }
  0x6d   : > { %7911 = vmatmul.mubr.msk.bf16.gmra.mrb[40].mxu1 %vm521_vm1, %v8799_v12  ;;  %8133 = vmatmul.mubr.msk.bf16.gmra.mrb[12].mxu0 %vm521_vm1, %v4068_v19  ;;  %v4082_v12 = vsel %vm1956_vm3, %v4079_v0, %v4081_v1  ;;  %v8822_v19 = vld [vmem:[%s9169_s21 + $0x48] sm:$0xff]   ;;  %v1242_v1 = vshrl.u32 %v8828_v55, 16 }
  0x6e   : > { %7914 = vmatprep.mubr.msk.bf16.mxu1 %vm521_vm1, %v8801_v14  ;;  %8136 = vmatprep.mubr.msk.bf16.mxu0 %vm521_vm1, %v4070_v21  ;;  %v8817_v14 = vld [vmem:[%s9169_s21 + $0x94] sm:$0xff]   ;;  %v1214_v29 = vshll.u32 %v8822_v19, 16  ;;  %v1218_v47 = vshrl.u32 %v8822_v19, 16 }
  0x6f   : > { %v4085_v21 = vrot.slane %v8817_v14, 1  ;;  %v4095_v14 = vrot.slane %v8827_v62, 1  ;;  %v8846_v62 = vld [vmem:[%s9169_s21 + $0xa8] sm:$0xff]  }
  0x70   : > { %v1216_v40 = vrot.slane %v1214_v29, 1 }
  0x71   : > { %v4086_v34 = vsel %vm1956_vm3, %v4083_v20, %v4085_v21 }
  0x75   : > { %7915 = vmatmul.mubr.msk.bf16.gmra.mrb[44].mxu1 %vm521_vm1, %v8803_v27  ;;  %8137 = vmatmul.mubr.msk.bf16.gmra.mrb[16].mxu0 %vm521_vm1, %v4072_v39  ;;  %v1210_v27 = vshrl.u32 %v8820_v15, 16 }
  0x76   : > { %7920 = vmatprep.mubr.msk.bf16.mxu1 %vm521_vm1, %v1153_v35  ;;  %8140 = vmatprep.mubr.msk.bf16.mxu0 %vm521_vm1, %v4074_v41  ;;  %v1208_v35 = vrot.slane %v1206_v22, 1  ;;  %v8826_v41 = vld [vmem:[%s9169_s21 + $0x58] sm:$0xff]   ;;  %v1262_v22 = vshll.u32 %v8834_v13, 16 }
  0x77   : > { %v1234_v63 = vshrl.u32 %v8826_v41, 16 }
  0x78   : > { %v1212_v39 = vor.u32 %v1210_v27, %v1208_v35  ;;  %v1209_v45 = vsel %vm1141_vm2, %v1204_v38, %v1208_v35  ;;  %v1266_v38 = vshrl.u32 %v8834_v13, 16 }
  0x7a   : > { %v1217_v48 = vsel %vm1141_vm2, %v1212_v39, %v1216_v40 }
  0x7d   : > { %7921 = vmatmul.mubr.msk.bf16.vlgmr.msra.gmra.mrb[0].mxu1 %vm521_vm1, %v1161_v50  ;;  %8141 = vmatmul.mubr.msk.bf16.gmra.mrb[20].mxu0 %vm521_vm1, %v4076_v56  ;;  %v1230_v50 = vshll.u32 %v8826_v41, 16  ;;  %v1220_v56 = vor.u32 %v1218_v47, %v1216_v40  ;;  %v1278_v41 = vshll.u32 %v8838_v33, 16 }
  0x7e   : > { %7924 = vmatprep.mubr.msk.bf16.mxu1 %vm521_vm1, %v1169_v53  ;;  %7969 = vmatpush3.bf16.msra.mxu1 %v2079_v51  ;;  %v4088_v51 = vsel %vm1956_vm3, %v4085_v21, %v4087_v42  ;;  %v4090_v53 = vsel %vm1956_vm3, %v4087_v42, %v4089_v43  ;;  %v1258_v21 = vshrl.u32 %v8832_v9, 16  ;;  %v8833_v43 = vld [vmem:[%s9169_s21 + $0x18] sm:$0xff]   ;;  %v8848_v9 = vld [vmem:[%s9169_s21 + $0xb0] sm:$0xff]  }
  0x7f   : > { %8144 = vmatprep.mubr.msk.bf16.mxu0 %vm521_vm1, %v4078_v58  ;;  %8691 = vmatprep.subr.msk.bf16.mxu1 %vm594_vm0, %v9360_v30  ;;  %v1232_v31 = vrot.slane %v1230_v50, 1  ;;  %v8830_v58 = vld [vmem:[%s9169_s21 + $0x68] sm:$0xff]   ;;  %v1225_v61 = vsel %vm1141_vm2, %v1220_v56, %v1224_v54  ;;  %v1294_v56 = vshll.u32 %v8842_v49, 16 }
  0x80   : > { %v1246_v2 = vshll.u32 %v8830_v58, 16  ;;  %v1250_v19 = vshrl.u32 %v8830_v58, 16  ;;  %v1260_v29 = vor.u32 %v1258_v21, %v1256_v25 }
  0x81   : > { %v1233_v0 = vsel %vm1141_vm2, %v1228_v57, %v1232_v31  ;;  %v1236_v10 = vor.u32 %v1234_v63, %v1232_v31  ;;  %v5602_v57 = vsel %vm594_vm0, %v9313_v28, 0  ;;  %v8837_v31 = vld [vmem:[%s9169_s21 + $0x28] sm:$0xff]   ;;  %v1296_v28 = vrot.slane %v1294_v56, 1 }
  0x82   : > { %v8863_v56 = vld [vmem:[%s9169_s21 + $0x28] sm:$0xff]  }
  0x83   : > { %v1241_v17 = vsel %vm1141_vm2, %v1236_v10, %v1240_v8 }
  0x85   : > { %7925 = vmatmul.mubr.msk.bf16.gmra.mrb[4].mxu1 %vm521_vm1, %v1177_v5  ;;  %8145 = vmatmul.mubr.msk.bf16.gmra.mrb[24].mxu0 %vm521_vm1, %v4080_v11  ;;  %v8829_v5 = vld [vmem:[%s9169_s21 + $0xc4] sm:$0xff]   ;;  %v1244_v11 = vor.u32 %v1242_v1, %v1240_v8  ;;  %v1298_v1 = vshrl.u32 %v8842_v49, 16  ;;  %v8841_v8 = vld [vmem:[%s9169_s21 + $0x38] sm:$0xff]  }
  0x86   : > { %7928 = vmatprep.mubr.msk.bf16.mxu1 %vm521_vm1, %v1185_v6  ;;  %8148 = vmatprep.mubr.msk.bf16.mxu0 %vm521_vm1, %v4082_v12  ;;  %v4094_v6 = vsel %vm1956_vm3, %v4091_v59, %v4093_v60  ;;  %v1248_v12 = vrot.slane %v1246_v2, 1  ;;  %v4097_v15 = vrot.slane %v8829_v5, 1  ;;  %v8844_v59 = vld [vmem:[%s9169_s21 + $0xa0] sm:$0xff]   ;;  %v8839_v2 = vld [vmem:[%s9169_s21 + $0x30] sm:$0xff]   ;;  %v8853_v49 = vld [vmem:[%s9169_s21 + $0x68] sm:$0xff]  }
  0x87   : > { %v1302_v63 = vshll.u32 %v8844_v59, 16  ;;  %v1306_v5 = vshrl.u32 %v8844_v59, 16  ;;  %v1966_v59 = vrot.slane %v8863_v56, 1  ;;  %v8888_v56 = vld [vmem:[%s9169_s21 + $0x88] sm:$0xff]  }
  0x88   : > { %v1249_v20 = vsel %vm1141_vm2, %v1244_v11, %v1248_v12  ;;  %v4098_v24 = vsel %vm1956_vm3, %v4095_v14, %v4097_v15  ;;  %v1252_v27 = vor.u32 %v1250_v19, %v1248_v12  ;;  %v1300_v11 = vor.u32 %v1298_v1, %v1296_v28  ;;  %v8850_v12 = vld [vmem:[%s9169_s21 + $0xb8] sm:$0xff]  }
  0x89   : > { %v1304_v10 = vrot.slane %v1302_v63, 1  ;;  %v1322_v19 = vshrl.u32 %v8848_v9, 16 }
  0x8a   : > { %v1257_v36 = vsel %vm1141_vm2, %v1252_v27, %v1256_v25  ;;  %v8852_v25 = vld [vmem:[%s9169_s21 + $0xc0] ss:$0 sps:$4 sm:$0x11]  }
  0x8b   : > { %v1308_v13 = vor.u32 %v1306_v5, %v1304_v10  ;;  %v8864_v5 = vld [vmem:[%s9169_s21 + $0x90] sm:$0xff]  }
  0x8d   : > { %7929 = vmatmul.mubr.msk.bf16.gmra.mrb[8].mxu1 %vm521_vm1, %v1193_v23  ;;  %8149 = vmatmul.mubr.msk.bf16.gmra.mrb[28].mxu0 %vm521_vm1, %v4084_v32  ;;  %v4096_v23 = vsel %vm1956_vm3, %v4093_v60, %v4095_v14  ;;  %v1264_v32 = vrot.slane %v1262_v22, 1  ;;  %v8845_v22 = vld [vmem:[%s9169_s21 + $0x48] sm:$0xff]  }
  0x8e   : > { %7932 = vmatprep.mubr.msk.bf16.mxu1 %vm521_vm1, %v1201_v26  ;;  %8152 = vmatprep.mubr.msk.bf16.mxu0 %vm521_vm1, %v4086_v34  ;;  %v8836_v26 = vld [vmem:[%s9169_s21 + $0x80] sm:$0xff]   ;;  %v4099_v34 = vrot.slane %v8831_v18, 1  ;;  %v1314_v18 = vshrl.u32 %v8846_v62, 16 }
  0x8f   : > { %v1270_v35 = vshll.u32 %v8836_v26, 16  ;;  %v1265_v39 = vsel %vm1141_vm2, %v1260_v29, %v1264_v32  ;;  %v1274_v40 = vshrl.u32 %v8836_v26, 16  ;;  %v1268_v46 = vor.u32 %v1266_v38, %v1264_v32  ;;  %v8847_v32 = vld [vmem:[%s9169_s21 + $0x50] sm:$0xff]  }
  0x90   : > { %v4100_v42 = vsel %vm1956_vm3, %v4097_v15, %v4099_v34  ;;  %v1318_v15 = vshll.u32 %v8848_v9, 16  ;;  %v1330_v29 = vshrl.u32 %v8850_v12, 16 }
  0x91   : > { %v1272_v44 = vrot.slane %v1270_v35, 1  ;;  %v1334_v35 = vshll.u32 %v8852_v25, 16  ;;  %v8879_v25 = vld [vmem:[%s9169_s21 + $0x68] sm:$0xff]  }
  0x93   : > { %v1276_v47 = vor.u32 %v1274_v40, %v1272_v44  ;;  %v1273_v52 = vsel %vm1141_vm2, %v1268_v46, %v1272_v44  ;;  %v8857_v44 = vld [vmem:[%s9169_s21 + $0x10] sm:$0xff]  }
  0x95   : > { %7933 = vmatmul.mubr.msk.bf16.gmra.mrb[12].mxu1 %vm521_vm1, %v1209_v45  ;;  %8153 = vmatmul.mubr.msk.bf16.gmra.mrb[32].mxu0 %vm521_vm1, %v4088_v51  ;;  %v8840_v45 = vld [vmem:[%s9169_s21 + $0x90] sm:$0xff]   ;;  %v8835_v51 = vld [vmem:[%s9169_s21 + $0x20] sm:$0xff]  }
  0x96   : > { %7936 = vmatprep.mubr.msk.bf16.mxu1 %vm521_vm1, %v1217_v48  ;;  %8156 = vmatprep.mubr.msk.bf16.mxu0 %vm521_vm1, %v4090_v53  ;;  %v1280_v48 = vrot.slane %v1278_v41, 1  ;;  %v1286_v50 = vshll.u32 %v8840_v45, 16  ;;  %v1282_v53 = vshrl.u32 %v8838_v33, 16  ;;  %v1290_v55 = vshrl.u32 %v8840_v45, 16  ;;  %v8854_v33 = vld [vmem:[%s9169_s21] sm:$0xfe]  }
  0x97   : > { %v1336_v41 = vrot.slane %v1334_v35, 1  ;;  %v8851_v45 = vld [vmem:[%s9169_s21 + $0x60] sm:$0xff]  }
  0x98   : > { %v1281_v54 = vsel %vm1141_vm2, %v1276_v47, %v1280_v48  ;;  %v1288_v58 = vrot.slane %v1286_v50, 1  ;;  %v1284_v60 = vor.u32 %v1282_v53, %v1280_v48  ;;  %v8859_v47 = vld [vmem:[%s9169_s21 + $0x18] sm:$0xff]   ;;  %v1960_v50 = vrot.slane %v8857_v44, 1  ;;  %v8856_v53 = vld [vmem:[%s9169_s21 + $0x70] sm:$0xff]  }
  0x9d   : > { %7937 = vmatmul.mubr.msk.bf16.gmra.mrb[16].mxu1 %vm521_vm1, %v1225_v61  ;;  %8157 = vmatmul.mubr.msk.bf16.gmra.mrb[36].mxu0 %vm521_vm1, %v4092_v3  ;;  %v1292_v61 = vor.u32 %v1290_v55, %v1288_v58  ;;  %v2693_v55 = vsel %vm594_vm0, %v9360_v30, 0  ;;  %v8978_v30 = vld [vmem:[%s9987_s1 + $0x8] sm:$0x3] }
  0x9e   : > { %7940 = vmatprep.mubr.msk.bf16.mxu1 %vm521_vm1, %v1233_v0  ;;  %8160 = vmatprep.mubr.msk.bf16.mxu0 %vm521_vm1, %v4094_v6  ;;  %v1289_v0 = vsel %vm1141_vm2, %v1284_v60, %v1288_v58  ;;  %v1310_v6 = vshll.u32 %v8846_v62, 16  ;;  %v8865_v60 = vld [vmem:[%s9169_s21 + $0x30] sm:$0xff]   ;;  %v8867_v62 = vld [vmem:[%s9169_s21 + $0x38] sm:$0xff]  }
  0x9f   : > { %v1297_v3 = vsel %vm1141_vm2, %v1292_v61, %v1296_v28  ;;  %v8860_v61 = vld [vmem:[%s9169_s21 + $0x80] sm:$0xff]   ;;  %v1968_v1 = vrot.slane %v8865_v60, 1 }
  0xa0   : > { %v1312_v14 = vrot.slane %v1310_v6, 1 }
  0xa1   : > { %v1969_v6 = vsel %vm1956_vm3, %v1966_v59, %v1968_v1 }
  0xa2   : > { %v1313_v21 = vsel %vm1141_vm2, %v1308_v13, %v1312_v14  ;;  %v8868_v13 = vld [vmem:[%s9169_s21 + $0xa0] sm:$0xff]  }
  0xa5   : > { %7941 = vmatmul.mubr.msk.bf16.gmra.mrb[20].mxu1 %vm521_vm1, %v1241_v17  ;;  %8161 = vmatmul.mubr.msk.bf16.gmra.mrb[40].mxu0 %vm521_vm1, %v4096_v23  ;;  %v1305_v17 = vsel %vm1141_vm2, %v1300_v11, %v1304_v10  ;;  %v1320_v23 = vrot.slane %v1318_v15, 1  ;;  %v8866_v10 = vld [vmem:[%s9169_s21 + $0x98] sm:$0xff]  }
  0xa6   : > { %7944 = vmatprep.mubr.msk.bf16.mxu1 %vm521_vm1, %v1249_v20  ;;  %8164 = vmatprep.mubr.msk.bf16.mxu0 %vm521_vm1, %v4098_v24  ;;  %v1326_v20 = vshll.u32 %v8850_v12, 16  ;;  %v1316_v24 = vor.u32 %v1314_v18, %v1312_v14  ;;  %v8873_v14 = vld [vmem:[%s9169_s21 + $0x50] sm:$0xff]  }
  0xa7   : > { %v1324_v26 = vor.u32 %v1322_v19, %v1320_v23  ;;  %v1976_v19 = vrot.slane %v8873_v14, 1 }
  0xa8   : > { %v1328_v27 = vrot.slane %v1326_v20, 1  ;;  %v1321_v34 = vsel %vm1141_vm2, %v1316_v24, %v1320_v23  ;;  %v8874_v24 = vld [vmem:[%s9169_s21 + $0xb8] sm:$0xff]  }
  0xaa   : > { %v1329_v38 = vsel %vm1141_vm2, %v1324_v26, %v1328_v27  ;;  %v1332_v40 = vor.u32 %v1330_v29, %v1328_v27  ;;  %v8882_v27 = vld [vmem:[%s9169_s21 + $0x18] sm:$0xff]  }
  0xab   : > { %v5336_v35 = vshll.u32 %v8882_v27, 16 }
  0xac   : > { %v1337_v46 = vsel %vm1141_vm2, %v1332_v40, %v1336_v41  ;;  %v8884_v40 = vld [vmem:[%s9169_s21 + $0x78] sm:$0xff]   ;;  %v8878_v41 = vld [vmem:[%s9169_s21 + $0xc8] sm:$0xff]  }
  0xad   : > { %7945 = vmatmul.mubr.msk.bf16.gmra.mrb[24].mxu1 %vm521_vm1, %v1257_v36  ;;  %8165 = vmatmul.mubr.msk.bf16.gmra.mrb[44].mxu0 %vm521_vm1, %v4100_v42  ;;  %v8855_v36 = vld [vmem:[%s9169_s21 + $0x8] sm:$0xff]   ;;  %v1957_v42 = vrot.slane %v8854_v33, 1  ;;  %v8876_v33 = vld [vmem:[%s9169_s21 + $0xc0] sm:$0xff]  }
  0xae   : > { %7948 = vmatprep.mubr.msk.bf16.mxu1 %vm521_vm1, %v1265_v39  ;;  %8170 = vmatprep.mubr.msk.bf16.mxu0 %vm521_vm1, %v8833_v43  ;;  %v8849_v39 = vld [vmem:[%s9169_s21 + $0x58] sm:$0xff]   ;;  %v1958_v43 = vrot.slane %v8855_v36, 1 }
  0xb0   : > { %v1959_v48 = vsel %vm1956_vm3, %v1957_v42, %v1958_v43  ;;  %v5334_v42 = vshrl.u32 %v8882_v27, 16 }
  0xb5   : > { %7949 = vmatmul.mubr.msk.bf16.gmra.mrb[28].mxu1 %vm521_vm1, %v1273_v52  ;;  %8171 = vmatmul.mubr.msk.bf16.vlgmr.msra.gmra.mrb[0].mxu0 %vm521_vm1, %v8835_v51  ;;  %v1962_v51 = vrot.slane %v8859_v47, 1  ;;  %v8861_v52 = vld [vmem:[%s9169_s21 + $0x20] sm:$0xff]   ;;  %v8885_v47 = vld [vmem:[%s9169_s21 + $0x28] sm:$0xff]  }
  0xb6   : > { %7952 = vmatprep.mubr.msk.bf16.mxu1 %vm521_vm1, %v1281_v54  ;;  %8219 = vmatpush3.bf16.msra.mxu0 %v5602_v57  ;;  %v1961_v54 = vsel %vm1956_vm3, %v1958_v43, %v1960_v50  ;;  %v1964_v58 = vrot.slane %v8861_v52, 1  ;;  %v5338_v43 = vrot.slane %v5336_v35, 1  ;;  %v8886_v52 = vld [vmem:[%s9169_s21 + $0x80] sm:$0xff]  }
  0xb7   : > { %8174 = vmatprep.mubr.msk.bf16.mxu0 %vm521_vm1, %v8837_v31  ;;  %8697 = vmatprep.subr.msk.bf16.mxu0 %vm594_vm0, %v9430_v7  ;;  %v1963_v57 = vsel %vm1956_vm3, %v1960_v50, %v1962_v51  ;;  %v8858_v31 = vld [vmem:[%s9169_s21 + $0x78] sm:$0xff]   ;;  %v8887_v50 = vld [vmem:[%s9169_s21 + $0x30] sm:$0xff]  }
  0xb8   : > { %v1965_v28 = vsel %vm1956_vm3, %v1962_v51, %v1964_v58  ;;  %v1967_v63 = vsel %vm1956_vm3, %v1964_v58, %v1966_v59  ;;  %v5353_v58 = vshrl.u32 %v8885_v47, 16  ;;  %v5357_v59 = vshll.u32 %v8887_v50, 16 }
  0xbd   : > { %7953 = vmatmul.mubr.msk.bf16.gmra.mrb[32].mxu1 %vm521_vm1, %v1289_v0  ;;  %8175 = vmatmul.mubr.msk.bf16.gmra.mrb[4].mxu0 %vm521_vm1, %v8839_v2  ;;  %v8862_v0 = vld [vmem:[%s9169_s21 + $0x88] sm:$0xff]   ;;  %v1970_v2 = vrot.slane %v8867_v62, 1 }
  0xbe   : > { %7956 = vmatprep.mubr.msk.bf16.mxu1 %vm521_vm1, %v1297_v3  ;;  %8178 = vmatprep.mubr.msk.bf16.mxu0 %vm521_vm1, %v8841_v8  ;;  %v8869_v3 = vld [vmem:[%s9169_s21 + $0x40] sm:$0xff]   ;;  %v8871_v8 = vld [vmem:[%s9169_s21 + $0x48] sm:$0xff]  }
  0xbf   : > { %v1971_v9 = vsel %vm1956_vm3, %v1968_v1, %v1970_v2  ;;  %v1972_v11 = vrot.slane %v8869_v3, 1  ;;  %v1974_v12 = vrot.slane %v8871_v8, 1  ;;  %v8891_v1 = vld [vmem:[%s9169_s21 + $0x40] sm:$0xff]   ;;  %v8890_v3 = vld [vmem:[%s9169_s21 + $0x90] sm:$0xff]   ;;  %v8892_v8 = vld [vmem:[%s9169_s21 + $0x98] sm:$0xff]  }
  0xc0   : > { %v5373_v14 = vshll.u32 %v8891_v1, 16 }
  0xc1   : > { %v1973_v15 = vsel %vm1956_vm3, %v1970_v2, %v1972_v11  ;;  %v1975_v18 = vsel %vm1956_vm3, %v1972_v11, %v1974_v12  ;;  %v1977_v23 = vsel %vm1956_vm3, %v1974_v12, %v1976_v19  ;;  %v6269_v11 = vsel %vm594_vm0, %v9430_v7, 0 }
  0xc5   : > { %7957 = vmatmul.mubr.msk.bf16.gmra.mrb[36].mxu1 %vm521_vm1, %v1305_v17  ;;  %8179 = vmatmul.mubr.msk.bf16.gmra.mrb[8].mxu0 %vm521_vm1, %v8843_v16  ;;  %v8870_v16 = vld [vmem:[%s9169_s21 + $0xa8] sm:$0xff]   ;;  %v8875_v17 = vld [vmem:[%s9169_s21 + $0x58] sm:$0xff]  }
  0xc6   : > { %7960 = vmatprep.mubr.msk.bf16.mxu1 %vm521_vm1, %v1313_v21  ;;  %8182 = vmatprep.mubr.msk.bf16.mxu0 %vm521_vm1, %v8845_v22  ;;  %v1978_v20 = vrot.slane %v8875_v17, 1  ;;  %v8872_v21 = vld [vmem:[%s9169_s21 + $0xb0] sm:$0xff]   ;;  %v8877_v22 = vld [vmem:[%s9169_s21 + $0x60] sm:$0xff]   ;;  %v1994_v17 = vrot.slane %v8892_v8, 1  ;;  %v8905_v8 = vld [vmem:[%s9169_s21 + $0x78] sm:$0xff]  }
  0xc7   : > { %v1980_v29 = vrot.slane %v8877_v22, 1 }
  0xc8   : > { %v1979_v26 = vsel %vm1956_vm3, %v1976_v19, %v1978_v20 }
  0xc9   : > { %v1981_v36 = vsel %vm1956_vm3, %v1978_v20, %v1980_v29  ;;  %v5375_v20 = vrot.slane %v5373_v14, 1  ;;  %v8904_v14 = vld [vmem:[%s9169_s21 + $0xc] sm:$0xff]  }
  0xcd   : > { %7961 = vmatmul.mubr.msk.bf16.gmra.mrb[40].mxu1 %vm521_vm1, %v1321_v34  ;;  %8183 = vmatmul.mubr.msk.bf16.gmra.mrb[12].mxu0 %vm521_vm1, %v8847_v32  ;;  %v1982_v32 = vrot.slane %v8879_v25, 1  ;;  %v8883_v34 = vld [vmem:[%s9169_s21 + $0x20] sm:$0xff]  }
  0xce   : > { %7964 = vmatprep.mubr.msk.bf16.mxu1 %vm521_vm1, %v1329_v38  ;;  %8186 = vmatprep.mubr.msk.bf16.mxu0 %vm521_vm1, %v8849_v39  ;;  %v8881_v38 = vld [vmem:[%s9169_s21 + $0x70] sm:$0xff]   ;;  %v5341_v44 = vshll.u32 %v8883_v34, 16 }
  0xcf   : > { %v1983_v39 = vsel %vm1956_vm3, %v1980_v29, %v1982_v32  ;;  %v5377_v29 = vshrl.u32 %v8891_v1, 16 }
  0xd5   : > { %7965 = vmatmul.mubr.msk.bf16.gmra.mrb[44].mxu1 %vm521_vm1, %v1337_v46  ;;  %8187 = vmatmul.mubr.msk.bf16.gmra.mrb[16].mxu0 %vm521_vm1, %v8851_v45  ;;  %v1984_v45 = vrot.slane %v8881_v38, 1  ;;  %v1986_v46 = vrot.slane %v8884_v40, 1  ;;  %v5379_v40 = vor.u32 %v5377_v29, %v5375_v20 }
  0xd6   : > { %7970 = vmatprep.mubr.msk.bf16.mxu1 %vm521_vm1, %v1959_v48  ;;  %8190 = vmatprep.mubr.msk.bf16.mxu0 %vm521_vm1, %v8853_v49  ;;  %v5339_v48 = vor.u32 %v5338_v43, %v5334_v42  ;;  %v5343_v49 = vrot.slane %v5341_v44, 1  ;;  %v8899_v43 = vld [vmem:[%s9169_s21 + $0x60] sm:$0xff]  }
  0xd7   : > { %v1985_v51 = vsel %vm1956_vm3, %v1982_v32, %v1984_v45 }
  0xdd   : > { %7971 = vmatmul.mubr.msk.bf16.vlgmr.msra.gmra.mrb[0].mxu1 %vm521_vm1, %v1961_v54  ;;  %8191 = vmatmul.mubr.msk.bf16.gmra.mrb[20].mxu0 %vm521_vm1, %v8856_v53  ;;  %v8880_v53 = vld [vmem:[%s9169_s21 + $0xd0] sm:$0xff]   ;;  %v1987_v54 = vsel %vm1956_vm3, %v1984_v45, %v1986_v46 }
  0xde   : > { %7974 = vmatprep.mubr.msk.bf16.mxu1 %vm521_vm1, %v1963_v57  ;;  %8019 = vmatpush3.bf16.msra.mxu1 %v2693_v55  ;;  %v5349_v55 = vshll.u32 %v8885_v47, 16  ;;  %v5345_v57 = vshrl.u32 %v8883_v34, 16  ;;  %v8898_v45 = vld [vmem:[%s9169_s21 + $0xb0] sm:$0xff]  }
  0xdf   : > { %8693 = vmatprep.subr.msk.bf16.mxu1 %vm594_vm0, %v8978_v30  ;;  %8194 = vmatprep.mubr.msk.bf16.mxu0 %vm521_vm1, %v8858_v31  ;;  %v5344_v31 = vsel %vm1141_vm2, %v5339_v48, %v5343_v49  ;;  %v1988_v30 = vrot.slane %v8886_v52, 1  ;;  %v8900_v48 = vld [vmem:[%s9169_s21 + $0xb8] sm:$0xff]  }
  0xe0   : > { %v5351_v60 = vrot.slane %v5349_v55, 1  ;;  %v5347_v62 = vor.u32 %v5345_v57, %v5343_v49  ;;  %v8901_v57 = vld [vmem:[%s9169_s21 + $0x68] sm:$0xff]  }
  0xe1   : > { %v1989_v2 = vsel %vm1956_vm3, %v1986_v46, %v1988_v30 }
  0xe5   : > { %7975 = vmatmul.mubr.msk.bf16.gmra.mrb[4].mxu1 %vm521_vm1, %v1965_v28  ;;  %8195 = vmatmul.mubr.msk.bf16.gmra.mrb[24].mxu0 %vm521_vm1, %v8860_v61  ;;  %v1990_v61 = vrot.slane %v8888_v56, 1  ;;  %v8889_v28 = vld [vmem:[%s9169_s21 + $0x38] sm:$0xff]   ;;  %v2002_v56 = vrot.slane %v8900_v48, 1 }
  0xe6   : > { %7978 = vmatprep.mubr.msk.bf16.mxu1 %vm521_vm1, %v1967_v63  ;;  %8198 = vmatprep.mubr.msk.bf16.mxu0 %vm521_vm1, %v8862_v0  ;;  %v5355_v63 = vor.u32 %v5353_v58, %v5351_v60  ;;  %v5359_v0 = vrot.slane %v5357_v59, 1 }
  0xe8   : > { %v5360_v12 = vsel %vm1141_vm2, %v5355_v63, %v5359_v0 }
  0xed   : > { %7979 = vmatmul.mubr.msk.bf16.gmra.mrb[8].mxu1 %vm521_vm1, %v1969_v6  ;;  %8199 = vmatmul.mubr.msk.bf16.gmra.mrb[28].mxu0 %vm521_vm1, %v8864_v5  ;;  %v1991_v5 = vsel %vm1956_vm3, %v1988_v30, %v1990_v61  ;;  %v5365_v6 = vshll.u32 %v8889_v28, 16  ;;  %v8903_v30 = vld [vmem:[%s9169_s21 + $0x70] sm:$0xff]  }
  0xee   : > { %7982 = vmatprep.mubr.msk.bf16.mxu1 %vm521_vm1, %v1971_v9  ;;  %8202 = vmatprep.mubr.msk.bf16.mxu0 %vm521_vm1, %v8866_v10  ;;  %v5352_v9 = vsel %vm1141_vm2, %v5347_v62, %v5351_v60  ;;  %v5361_v10 = vshrl.u32 %v8887_v50, 16  ;;  %v5413_v62 = vshll.u32 %v8901_v57, 16 }
  0xf0   : > { %v5363_v7 = vor.u32 %v5361_v10, %v5359_v0  ;;  %v5409_v0 = vshrl.u32 %v8899_v43, 16 }
  0xf5   : > { %7983 = vmatmul.mubr.msk.bf16.gmra.mrb[12].mxu1 %vm521_vm1, %v1973_v15  ;;  %8203 = vmatmul.mubr.msk.bf16.gmra.mrb[32].mxu0 %vm521_vm1, %v8868_v13  ;;  %v5369_v13 = vshrl.u32 %v8889_v28, 16  ;;  %v1992_v15 = vrot.slane %v8890_v3, 1  ;;  %v5421_v3 = vshll.u32 %v8903_v30, 16 }
  0xf6   : > { %7986 = vmatprep.mubr.msk.bf16.mxu1 %vm521_vm1, %v1975_v18  ;;  %8206 = vmatprep.mubr.msk.bf16.mxu0 %vm521_vm1, %v8870_v16  ;;  %v5367_v16 = vrot.slane %v5365_v6, 1  ;;  %v8893_v18 = vld [vmem:[%s9169_s21 + $0x48] sm:$0xff]   ;;  %v5415_v6 = vrot.slane %v5413_v62, 1 }
  0xf7   : > { %v1993_v22 = vsel %vm1956_vm3, %v1990_v61, %v1992_v15  ;;  %v5381_v25 = vshll.u32 %v8893_v18, 16  ;;  %v8902_v61 = vld [vmem:[%s9169_s21 + $0xc0] ss:$0 sps:$4 sm:$0x11]  }
  0xf8   : > { %v5371_v19 = vor.u32 %v5369_v13, %v5367_v16  ;;  %v5368_v27 = vsel %vm1141_vm2, %v5363_v7, %v5367_v16  ;;  %v5433_v7 = vshrl.u32 %v8905_v8, 16 }
  0xfa   : > { %v5376_v32 = vsel %vm1141_vm2, %v5371_v19, %v5375_v20 }
  0xfd   : > { %7987 = vmatmul.mubr.msk.bf16.gmra.mrb[16].mxu1 %vm521_vm1, %v1977_v23  ;;  %8207 = vmatmul.mubr.msk.bf16.gmra.mrb[36].mxu0 %vm521_vm1, %v8872_v21  ;;  %v8895_v21 = vld [vmem:[%s9169_s21 + $0x50] sm:$0xff]   ;;  %v8894_v23 = vld [vmem:[%s9169_s21 + $0xa0] sm:$0xff]  }
  0xfe   : > { %7990 = vmatprep.mubr.msk.bf16.mxu1 %vm521_vm1, %v1979_v26  ;;  %8210 = vmatprep.mubr.msk.bf16.mxu0 %vm521_vm1, %v8874_v24  ;;  %v1995_v24 = vsel %vm1956_vm3, %v1992_v15, %v1994_v17  ;;  %v8896_v26 = vld [vmem:[%s9169_s21 + $0xa8] sm:$0xff]   ;;  %v5389_v34 = vshll.u32 %v8895_v21, 16  ;;  %v1996_v35 = vrot.slane %v8894_v23, 1  ;;  %v5393_v50 = vshrl.u32 %v8895_v21, 16  ;;  %v8906_v23 = vld [vmem:[%s9169_s21 + $0x14] sm:$0xff]  }
  0xff   : > { %v1998_v38 = vrot.slane %v8896_v26, 1  ;;  %v5429_v15 = vshll.u32 %v8905_v8, 16  ;;  %v8909_v21 = vld [vmem:[%s9169_s21 + $0x88] sm:$0xff]   ;;  %v8911_v26 = vld [vmem:[%s9169_s21 + $0x90] sm:$0xff]  }
 0x100   : > { %v5391_v42 = vrot.slane %v5389_v34, 1  ;;  %v1997_v44 = vsel %vm1956_vm3, %v1994_v17, %v1996_v35  ;;  %v5425_v17 = vshrl.u32 %v8903_v30, 16  ;;  %v5445_v29 = vshll.u32 %v8909_v21, 16 }
 0x101   : > { %v1999_v46 = vsel %vm1956_vm3, %v1996_v35, %v1998_v38  ;;  %v5431_v20 = vrot.slane %v5429_v15, 1  ;;  %v5449_v35 = vshrl.u32 %v8909_v21, 16  ;;  %v8925_v15 = vld [vmem:[%s9169_s21 + $0xc8] sm:$0xff]  }
 0x102   : > { %v5509_v21 = vshll.u32 %v8925_v15, 16 }
 0x105   : > { %7991 = vmatmul.mubr.msk.bf16.gmra.mrb[20].mxu1 %vm521_vm1, %v1981_v36  ;;  %8211 = vmatmul.mubr.msk.bf16.gmra.mrb[40].mxu0 %vm521_vm1, %v8876_v33  ;;  %v5385_v33 = vshrl.u32 %v8893_v18, 16  ;;  %v5383_v36 = vrot.slane %v5381_v25, 1 }
 0x106   : > { %7994 = vmatprep.mubr.msk.bf16.mxu1 %vm521_vm1, %v1983_v39  ;;  %8214 = vmatprep.mubr.msk.bf16.mxu0 %vm521_vm1, %v8878_v41  ;;  %v8897_v39 = vld [vmem:[%s9169_s21 + $0x58] sm:$0xff]  }
 0x107   : > { %v5387_v41 = vor.u32 %v5385_v33, %v5383_v36  ;;  %v5397_v47 = vshll.u32 %v8897_v39, 16  ;;  %v5384_v49 = vsel %vm1141_vm2, %v5379_v40, %v5383_v36  ;;  %v5401_v52 = vshrl.u32 %v8897_v39, 16  ;;  %v8913_v39 = vld [vmem:[%s9169_s21 + $0x98] sm:$0xff]  }
 0x108   : > { %v5453_v36 = vshll.u32 %v8911_v26, 16 }
 0x109   : > { %v5399_v55 = vrot.slane %v5397_v47, 1 }
 0x10b   : > { %v5403_v58 = vor.u32 %v5401_v52, %v5399_v55  ;;  %v8917_v52 = vld [vmem:[%s9169_s21 + $0xa8] sm:$0xff]  }
 0x10d   : > { %7995 = vmatmul.mubr.msk.bf16.gmra.mrb[24].mxu1 %vm521_vm1, %v1985_v51  ;;  %8215 = vmatmul.mubr.msk.bf16.gmra.mrb[44].mxu0 %vm521_vm1, %v8880_v53  ;;  %v5392_v51 = vsel %vm1141_vm2, %v5387_v41, %v5391_v42  ;;  %v5405_v53 = vshll.u32 %v8899_v43, 16  ;;  %v8910_v41 = vld [vmem:[%s9169_s21 + $0x24] sm:$0xff]   ;;  %v5455_v43 = vrot.slane %v5453_v36, 1  ;;  %v8928_v36 = vld [vmem:[%s9169_s21 + $0x6c] sm:$0xff]  }
 0x10e   : > { %7998 = vmatprep.mubr.msk.bf16.mxu1 %vm521_vm1, %v1987_v54  ;;  %8220 = vmatprep.mubr.msk.bf16.mxu0 %vm521_vm1, %v5344_v31  ;;  %v2000_v54 = vrot.slane %v8898_v45, 1  ;;  %v5395_v31 = vor.u32 %v5393_v50, %v5391_v42  ;;  %v8912_v45 = vld [vmem:[%s9169_s21 + $0x2c] sm:$0xff]  }
 0x10f   : > { %v5407_v59 = vrot.slane %v5405_v53, 1 }
 0x110   : > { %v2001_v60 = vsel %vm1956_vm3, %v1998_v38, %v2000_v54  ;;  %v2003_v28 = vsel %vm1956_vm3, %v2000_v54, %v2002_v56  ;;  %v5400_v63 = vsel %vm1141_vm2, %v5395_v31, %v5399_v55  ;;  %v5447_v38 = vrot.slane %v5445_v29, 1  ;;  %v8914_v54 = vld [vmem:[%s9169_s21 + $0x34] sm:$0xff]   ;;  %v8916_v31 = vld [vmem:[%s9169_s21 + $0x3c] sm:$0xff]  }
 0x111   : > { %v5408_v1 = vsel %vm1141_vm2, %v5403_v58, %v5407_v59  ;;  %v5477_v58 = vshll.u32 %v8917_v52, 16 }
 0x112   : > { %v5451_v42 = vor.u32 %v5449_v35, %v5447_v38 }
 0x113   : > { %v5479_v62 = vrot.slane %v5477_v58, 1 }
 0x114   : > { %v5456_v48 = vsel %vm1141_vm2, %v5451_v42, %v5455_v43  ;;  %v8931_v42 = vld [vmem:[%s9169_s21 + $0x18] sm:$0xfe]  }
 0x115   : > { %7999 = vmatmul.mubr.msk.bf16.gmra.mrb[28].mxu1 %vm521_vm1, %v1989_v2  ;;  %8221 = vmatmul.mubr.msk.bf16.vlgmr.msra.gmra.mrb[0].mxu0 %vm521_vm1, %v5352_v9  ;;  %v5417_v2 = vshrl.u32 %v8901_v57, 16  ;;  %v5411_v9 = vor.u32 %v5409_v0, %v5407_v59  ;;  %v8919_v57 = vld [vmem:[%s9169_s21 + $0xb0] sm:$0xff]  }
 0x116   : > { %8002 = vmatprep.mubr.msk.bf16.mxu1 %vm521_vm1, %v1991_v5  ;;  %8269 = vmatpush3.bf16.msra.mxu0 %v6269_v11  ;;  %v2004_v5 = vrot.slane %v8902_v61, 1  ;;  %v5423_v11 = vrot.slane %v5421_v3, 1  ;;  %v5481_v61 = vshrl.u32 %v8917_v52, 16  ;;  %v8936_v52 = vld [vmem:[%s9169_s21 + $0x30] sm:$0xff]  }
 0x117   : > { %8224 = vmatprep.mubr.msk.bf16.mxu0 %vm521_vm1, %v5360_v12  ;;  %v5419_v10 = vor.u32 %v5417_v2, %v5415_v6  ;;  %v8907_v12 = vld [vmem:[%s9169_s21 + $0x80] sm:$0xff]   ;;  %v5416_v16 = vsel %vm1141_vm2, %v5411_v9, %v5415_v6  ;;  %v8920_v6 = vld [vmem:[%s9169_s21 + $0x4c] sm:$0xff]  }
 0x118   : > { %v2005_v13 = vsel %vm1956_vm3, %v2002_v56, %v2004_v5  ;;  %v5437_v19 = vshll.u32 %v8907_v12, 16  ;;  %v5441_v33 = vshrl.u32 %v8907_v12, 16  ;;  %v5483_v2 = vor.u32 %v5481_v61, %v5479_v62  ;;  %v8923_v5 = vld [vmem:[%s9169_s21 + $0xc0] sm:$0xff]  }
 0x119   : > { %v5424_v18 = vsel %vm1141_vm2, %v5419_v10, %v5423_v11  ;;  %v5489_v10 = vshrl.u32 %v8919_v57, 16 }
 0x11a   : > { %v5439_v25 = vrot.slane %v5437_v19, 1  ;;  %v8927_v19 = vld [vmem:[%s9169_s21 + $0xd0] sm:$0xff]  }
 0x11c   : > { %v5443_v40 = vor.u32 %v5441_v33, %v5439_v25  ;;  %v8926_v33 = vld [vmem:[%s9169_s21 + $0x64] sm:$0xff]  }
 0x11d   : > { %8003 = vmatmul.mubr.msk.bf16.gmra.mrb[32].mxu1 %vm521_vm1, %v1993_v22  ;;  %8225 = vmatmul.mubr.msk.bf16.gmra.mrb[4].mxu0 %vm521_vm1, %v5368_v27  ;;  %v5427_v22 = vor.u32 %v5425_v17, %v5423_v11  ;;  %v8908_v27 = vld [vmem:[%s9169_s21 + $0x1c] sm:$0xff]   ;;  %v8922_v17 = vld [vmem:[%s9169_s21 + $0x54] sm:$0xff]  }
 0x11e   : > { %8006 = vmatprep.mubr.msk.bf16.mxu1 %vm521_vm1, %v1995_v24  ;;  %8228 = vmatprep.mubr.msk.bf16.mxu0 %vm521_vm1, %v5376_v32  ;;  %v5435_v24 = vor.u32 %v5433_v7, %v5431_v20  ;;  %v5448_v47 = vsel %vm1141_vm2, %v5443_v40, %v5447_v38 }
 0x11f   : > { %v5432_v32 = vsel %vm1141_vm2, %v5427_v22, %v5431_v20  ;;  %v8924_v20 = vld [vmem:[%s9169_s21 + $0x5c] sm:$0xff]  }
 0x120   : > { %v5440_v34 = vsel %vm1141_vm2, %v5435_v24, %v5439_v25  ;;  %v5513_v25 = vshrl.u32 %v8925_v15, 16 }
 0x125   : > { %8007 = vmatmul.mubr.msk.bf16.gmra.mrb[36].mxu1 %vm521_vm1, %v1997_v44  ;;  %8229 = vmatmul.mubr.msk.bf16.gmra.mrb[8].mxu0 %vm521_vm1, %v5384_v49  ;;  %v8915_v44 = vld [vmem:[%s9169_s21 + $0xa0] sm:$0xff]   ;;  %v5465_v49 = vshrl.u32 %v8913_v39, 16 }
 0x126   : > { %8010 = vmatprep.mubr.msk.bf16.mxu1 %vm521_vm1, %v1999_v46  ;;  %8232 = vmatprep.mubr.msk.bf16.mxu0 %vm521_vm1, %v5392_v51  ;;  %v5461_v46 = vshll.u32 %v8913_v39, 16  ;;  %v5469_v50 = vshll.u32 %v8915_v44, 16  ;;  %v5473_v30 = vshrl.u32 %v8915_v44, 16  ;;  %v5521_v39 = vshrl.u32 %v8927_v19, 16 }
 0x128   : > { %v5463_v51 = vrot.slane %v5461_v46, 1  ;;  %v5471_v56 = vrot.slane %v5469_v50, 1  ;;  %v8930_v46 = vld [vmem:[%s9169_s21 + $0x74] sm:$0xff]   ;;  %v8934_v50 = vld [vmem:[%s9169_s21 + $0x28] sm:$0xff]  }
 0x12a   : > { %v5467_v55 = vor.u32 %v5465_v49, %v5463_v51  ;;  %v5475_v0 = vor.u32 %v5473_v30, %v5471_v56 }
 0x12c   : > { %v5480_v9 = vsel %vm1141_vm2, %v5475_v0, %v5479_v62 }
 0x12d   : > { %8011 = vmatmul.mubr.msk.bf16.gmra.mrb[40].mxu1 %vm521_vm1, %v2001_v60  ;;  %8233 = vmatmul.mubr.msk.bf16.gmra.mrb[12].mxu0 %vm521_vm1, %v5400_v63  ;;  %v5472_v60 = vsel %vm1141_vm2, %v5467_v55, %v5471_v56  ;;  %v8921_v63 = vld [vmem:[%s9169_s21 + $0xb8] sm:$0xff]   ;;  %v6152_v55 = vrot.slane %v8936_v52, 1  ;;  %v8937_v56 = vld [vmem:[%s9169_s21 + $0x8c] sm:$0xff]  }
 0x12e   : > { %8014 = vmatprep.mubr.msk.bf16.mxu1 %vm521_vm1, %v2003_v28  ;;  %8236 = vmatprep.mubr.msk.bf16.mxu0 %vm521_vm1, %v5408_v1  ;;  %v5485_v28 = vshll.u32 %v8919_v57, 16  ;;  %v8918_v1 = vld [vmem:[%s9169_s21 + $0x44] sm:$0xff]   ;;  %v5493_v8 = vshll.u32 %v8921_v63, 16  ;;  %v5497_v12 = vshrl.u32 %v8921_v63, 16 }
 0x12f   : > { %v8942_v63 = vld [vmem:[%s9169_s21 + $0x48] sm:$0xff]  }
 0x130   : > { %v5487_v3 = vrot.slane %v5485_v28, 1  ;;  %v8941_v28 = vld [vmem:[%s9169_s21 + $0x9c] sm:$0xff]  }
 0x132   : > { %v5488_v11 = vsel %vm1141_vm2, %v5483_v2, %v5487_v3  ;;  %v6158_v2 = vrot.slane %v8942_v63, 1 }
 0x135   : > { %8015 = vmatmul.mubr.msk.bf16.gmra.mrb[44].mxu1 %vm521_vm1, %v2005_v13  ;;  %8237 = vmatmul.mubr.msk.bf16.gmra.mrb[16].mxu0 %vm521_vm1, %v5416_v16  ;;  %v5501_v13 = vshll.u32 %v8923_v5, 16  ;;  %v5491_v16 = vor.u32 %v5489_v10, %v5487_v3  ;;  %v8943_v3 = vld [vmem:[%s9169_s21 + $0xa4] sm:$0xff]  }
 0x136   : > { %8020 = vmatprep.mubr.msk.bf16.mxu1 %vm521_vm1, %v8904_v14  ;;  %8240 = vmatprep.mubr.msk.bf16.mxu0 %vm521_vm1, %v5424_v18  ;;  %v5495_v14 = vrot.slane %v5493_v8, 1 }
 0x137   : > { %v5503_v7 = vrot.slane %v5501_v13, 1 }
 0x138   : > { %v5499_v18 = vor.u32 %v5497_v12, %v5495_v14  ;;  %v5496_v22 = vsel %vm1141_vm2, %v5491_v16, %v5495_v14  ;;  %v8953_v12 = vld [vmem:[%s9169_s21 + $0x74] sm:$0xff]   ;;  %v8949_v16 = vld [vmem:[%s9169_s21 + $0xbc] sm:$0xff]  }
 0x139   : > { %v8947_v14 = vld [vmem:[%s9169_s21 + $0xb4] sm:$0xff]  }
 0x13a   : > { %v5504_v24 = vsel %vm1141_vm2, %v5499_v18, %v5503_v7 }
 0x13d   : > { %8021 = vmatmul.mubr.msk.bf16.vlgmr.msra.gmra.mrb[0].mxu1 %vm521_vm1, %v8906_v23  ;;  %8241 = vmatmul.mubr.msk.bf16.gmra.mrb[20].mxu0 %vm521_vm1, %v5432_v32  ;;  %v5505_v23 = vshrl.u32 %v8923_v5, 16  ;;  %v8929_v32 = vld [vmem:[%s9169_s21 + $0xd8] ss:$0 sps:$4 sm:$0x11]  }
 0x13e   : > { %8024 = vmatprep.mubr.msk.bf16.mxu1 %vm521_vm1, %v8908_v27  ;;  %8319 = vmatpush3.bf16.msra.mxu1 %v9158_v4  ;;  %v5457_v4 = vshrl.u32 %v8911_v26, 16  ;;  %v5517_v26 = vshll.u32 %v8927_v19, 16  ;;  %v5511_v27 = vrot.slane %v5509_v21, 1  ;;  %v5525_v40 = vshll.u32 %v8929_v32, 16 }
 0x13f   : > { %8244 = vmatprep.mubr.msk.bf16.mxu0 %vm521_vm1, %v5440_v34  ;;  %v5507_v29 = vor.u32 %v5505_v23, %v5503_v7  ;;  %v3342_v7 = vshll.u32 %v8953_v12, 16  ;;  %v8955_v23 = vld [vmem:[%s9169_s21 + $0x7c] sm:$0xff]  }
 0x140   : > { %v5459_v53 = vor.u32 %v5457_v4, %v5455_v43  ;;  %v5515_v34 = vor.u32 %v5513_v25, %v5511_v27  ;;  %v5519_v35 = vrot.slane %v5517_v26, 1  ;;  %v8932_v43 = vld [vmem:[%s9169_s21 + $0x20] sm:$0xff]  }
 0x141   : > { %v5512_v38 = vsel %vm1141_vm2, %v5507_v29, %v5511_v27  ;;  %v6148_v4 = vrot.slane %v8932_v43, 1  ;;  %v3344_v25 = vrot.slane %v3342_v7, 1  ;;  %v8957_v26 = vld [vmem:[%s9169_s21 + $0x84] sm:$0xff]   ;;  %v8959_v43 = vld [vmem:[%s9169_s21 + $0x8c] sm:$0xff]  }
 0x142   : > { %v5464_v59 = vsel %vm1141_vm2, %v5459_v53, %v5463_v51  ;;  %v5523_v44 = vor.u32 %v5521_v39, %v5519_v35  ;;  %v6150_v53 = vrot.slane %v8934_v50, 1  ;;  %v8951_v29 = vld [vmem:[%s9169_s21 + $0xc4] sm:$0xff]  }
 0x144   : > { %v6151_v57 = vsel %vm1956_vm3, %v6148_v4, %v6150_v53  ;;  %v6153_v58 = vsel %vm1956_vm3, %v6150_v53, %v6152_v55  ;;  %v3370_v53 = vshrl.u32 %v8959_v43, 16 }
 0x145   : > { %8025 = vmatmul.mubr.msk.bf16.gmra.mrb[4].mxu1 %vm521_vm1, %v8910_v41  ;;  %8245 = vmatmul.mubr.msk.bf16.gmra.mrb[24].mxu0 %vm521_vm1, %v5448_v47  ;;  %v5520_v41 = vsel %vm1141_vm2, %v5515_v34, %v5519_v35  ;;  %v6147_v47 = vrot.slane %v8931_v42, 1  ;;  %v3346_v34 = vshrl.u32 %v8953_v12, 16  ;;  %v8956_v42 = vld [vmem:[%s9169_s21 + $0x80] sm:$0xff]  }
 0x146   : > { %8028 = vmatprep.mubr.msk.bf16.mxu1 %vm521_vm1, %v8912_v45  ;;  %8248 = vmatprep.mubr.msk.bf16.mxu0 %vm521_vm1, %v5456_v48  ;;  %v5527_v45 = vrot.slane %v5525_v40, 1  ;;  %v8933_v48 = vld [vmem:[%s9169_s21 + $0x7c] sm:$0xff]  }
 0x147   : > { %v6149_v51 = vsel %vm1956_vm3, %v6147_v47, %v6148_v4  ;;  %v8954_v40 = vld [vmem:[%s9169_s21 + $0x78] sm:$0xff]   ;;  %v8964_v12 = vld [vmem:[%s9169_s21 + $0xa0] sm:$0xff]  }
 0x148   : > { %v5528_v49 = vsel %vm1141_vm2, %v5523_v44, %v5527_v45  ;;  %v3348_v44 = vor.u32 %v3346_v34, %v3344_v25  ;;  %v8961_v47 = vld [vmem:[%s9169_s21 + $0x94] sm:$0xff]   ;;  %v6170_v4 = vrot.slane %v8954_v40, 1  ;;  %v6180_v7 = vrot.slane %v8964_v12, 1 }
 0x14d   : > { %8029 = vmatmul.mubr.msk.bf16.gmra.mrb[8].mxu1 %vm521_vm1, %v8914_v54  ;;  %8249 = vmatmul.mubr.msk.bf16.gmra.mrb[28].mxu0 %vm521_vm1, %v5464_v59  ;;  %v8935_v54 = vld [vmem:[%s9169_s21 + $0x84] sm:$0xff]  }
 0x14e   : > { %8032 = vmatprep.mubr.msk.bf16.mxu1 %vm521_vm1, %v8916_v31  ;;  %8252 = vmatprep.mubr.msk.bf16.mxu0 %vm521_vm1, %v5472_v60  ;;  %v8938_v31 = vld [vmem:[%s9169_s21 + $0x38] sm:$0xff]   ;;  %v8940_v59 = vld [vmem:[%s9169_s21 + $0x40] sm:$0xff]  }
 0x14f   : > { %v6154_v30 = vrot.slane %v8938_v31, 1  ;;  %v8939_v60 = vld [vmem:[%s9169_s21 + $0x94] sm:$0xff]   ;;  %v6156_v61 = vrot.slane %v8940_v59, 1  ;;  %v8963_v59 = vld [vmem:[%s9169_s21 + $0x9c] sm:$0xff]  }
 0x151   : > { %v6155_v62 = vsel %vm1956_vm3, %v6152_v55, %v6154_v30  ;;  %v6157_v0 = vsel %vm1956_vm3, %v6154_v30, %v6156_v61  ;;  %v6159_v8 = vsel %vm1956_vm3, %v6156_v61, %v6158_v2 }
 0x155   : > { %8033 = vmatmul.mubr.msk.bf16.gmra.mrb[12].mxu1 %vm521_vm1, %v8918_v1  ;;  %8253 = vmatmul.mubr.msk.bf16.gmra.mrb[32].mxu0 %vm521_vm1, %v5480_v9  ;;  %v8944_v1 = vld [vmem:[%s9169_s21 + $0x50] sm:$0xff]   ;;  %v8946_v9 = vld [vmem:[%s9169_s21 + $0x58] sm:$0xff]  }
 0x156   : > { %8036 = vmatprep.mubr.msk.bf16.mxu1 %vm521_vm1, %v8920_v6  ;;  %8256 = vmatprep.mubr.msk.bf16.mxu0 %vm521_vm1, %v5488_v11  ;;  %v6160_v5 = vrot.slane %v8944_v1, 1  ;;  %v8945_v6 = vld [vmem:[%s9169_s21 + $0xac] sm:$0xff]   ;;  %v8948_v11 = vld [vmem:[%s9169_s21 + $0x60] sm:$0xff]   ;;  %v6162_v13 = vrot.slane %v8946_v9, 1  ;;  %v8962_v9 = vld [vmem:[%s9169_s21 + $0x98] sm:$0xff]  }
 0x157   : > { %v6164_v15 = vrot.slane %v8948_v11, 1 }
 0x158   : > { %v6161_v10 = vsel %vm1956_vm3, %v6158_v2, %v6160_v5  ;;  %v6163_v19 = vsel %vm1956_vm3, %v6160_v5, %v6162_v13  ;;  %v3378_v2 = vshrl.u32 %v8961_v47, 16  ;;  %v3386_v5 = vshrl.u32 %v8963_v59, 16 }
 0x159   : > { %v6165_v21 = vsel %vm1956_vm3, %v6162_v13, %v6164_v15  ;;  %v8967_v13 = vld [vmem:[%s9169_s21 + $0xac] sm:$0xff]  }
 0x15d   : > { %8037 = vmatmul.mubr.msk.bf16.gmra.mrb[16].mxu1 %vm521_vm1, %v8922_v17  ;;  %8257 = vmatmul.mubr.msk.bf16.gmra.mrb[36].mxu0 %vm521_vm1, %v5496_v22  ;;  %v8979_v17 = vld [vmem:[%s9169_s21 + $0x6c] sm:$0xff]  }
 0x15e   : > { %8040 = vmatprep.mubr.msk.bf16.mxu1 %vm521_vm1, %v8924_v20  ;;  %8260 = vmatprep.mubr.msk.bf16.mxu0 %vm521_vm1, %v5504_v24  ;;  %v3338_v18 = vshrl.u32 %v8979_v17, 16  ;;  %v8950_v20 = vld [vmem:[%s9169_s21 + $0x68] sm:$0xff]   ;;  %v8952_v22 = vld [vmem:[%s9169_s21 + $0x70] sm:$0xff]  }
 0x15f   : > { %v6166_v27 = vrot.slane %v8950_v20, 1  ;;  %v6168_v32 = vrot.slane %v8952_v22, 1  ;;  %v8969_v17 = vld [vmem:[%s9169_s21 + $0xb4] sm:$0xff]  }
 0x160   : > { %v3340_v24 = vor.u32 %v3338_v18, %v9250_v37  ;;  %v6178_v18 = vrot.slane %v8962_v9, 1 }
 0x161   : > { %v6167_v39 = vsel %vm1956_vm3, %v6164_v15, %v6166_v27  ;;  %v6169_v37 = vsel %vm1956_vm3, %v6166_v27, %v6168_v32  ;;  %v6171_v55 = vsel %vm1956_vm3, %v6168_v32, %v6170_v4  ;;  %v8968_v32 = vld [vmem:[%s9169_s21 + $0xb0] sm:$0xff]  }
 0x162   : > { %v3345_v35 = vsel %vm1141_vm2, %v3340_v24, %v3344_v25  ;;  %v3406_v24 = vshll.u32 %v8969_v17, 16  ;;  %v6181_v27 = vsel %vm1956_vm3, %v6178_v18, %v6180_v7  ;;  %v6184_v40 = vrot.slane %v8968_v32, 1 }
 0x165   : > { %8041 = vmatmul.mubr.msk.bf16.gmra.mrb[20].mxu1 %vm521_vm1, %v8926_v33  ;;  %8261 = vmatmul.mubr.msk.bf16.gmra.mrb[40].mxu0 %vm521_vm1, %v5512_v38  ;;  %v3350_v33 = vshll.u32 %v8955_v23, 16  ;;  %v3358_v38 = vshll.u32 %v8957_v26, 16 }
 0x166   : > { %8044 = vmatprep.mubr.msk.bf16.mxu1 %vm521_vm1, %v8928_v36  ;;  %8264 = vmatprep.mubr.msk.bf16.mxu0 %vm521_vm1, %v5520_v41  ;;  %v3354_v36 = vshrl.u32 %v8955_v23, 16  ;;  %v3402_v23 = vshrl.u32 %v8967_v13, 16 }
 0x167   : > { %v3352_v41 = vrot.slane %v3350_v33, 1  ;;  %v8971_v33 = vld [vmem:[%s9169_s21 + $0xbc] sm:$0xff]  }
 0x169   : > { %v3356_v45 = vor.u32 %v3354_v36, %v3352_v41  ;;  %v3353_v50 = vsel %vm1141_vm2, %v3348_v44, %v3352_v41  ;;  %v3408_v36 = vrot.slane %v3406_v24, 1  ;;  %v3418_v44 = vshrl.u32 %v8971_v33, 16 }
 0x16d   : > { %8045 = vmatmul.mubr.msk.bf16.gmra.mrb[24].mxu1 %vm521_vm1, %v8930_v46  ;;  %8265 = vmatmul.mubr.msk.bf16.gmra.mrb[44].mxu0 %vm521_vm1, %v5528_v49  ;;  %v3360_v46 = vrot.slane %v3358_v38, 1  ;;  %v3366_v49 = vshll.u32 %v8959_v43, 16  ;;  %v8973_v38 = vld [vmem:[%s9169_s21 + $0xc4] sm:$0xff]  }
 0x16e   : > { %8048 = vmatprep.mubr.msk.bf16.mxu1 %vm521_vm1, %v8933_v48  ;;  %8270 = vmatprep.mubr.msk.bf16.mxu0 %vm521_vm1, %v6149_v51  ;;  %v6172_v48 = vrot.slane %v8956_v42, 1  ;;  %v3362_v51 = vshrl.u32 %v8957_v26, 16  ;;  %v8966_v26 = vld [vmem:[%s9169_s21 + $0xa8] sm:$0xff]   ;;  %v3410_v42 = vshrl.u32 %v8969_v17, 16 }
 0x16f   : > { %v3361_v52 = vsel %vm1141_vm2, %v3356_v45, %v3360_v46  ;;  %v3368_v31 = vrot.slane %v3366_v49, 1  ;;  %v3422_v45 = vshll.u32 %v8973_v38, 16  ;;  %v8972_v49 = vld [vmem:[%s9169_s21 + $0xc0] sm:$0xff]  }
 0x170   : > { %v3364_v30 = vor.u32 %v3362_v51, %v3360_v46  ;;  %v8975_v51 = vld [vmem:[%s9169_s21 + $0xcc] ss:$0 sps:$4 sm:$0x11]  }
 0x172   : > { %v3369_v1 = vsel %vm1141_vm2, %v3364_v30, %v3368_v31  ;;  %v8974_v30 = vld [vmem:[%s9169_s21 + $0xc8] sm:$0xff]  }
 0x175   : > { %8049 = vmatmul.mubr.msk.bf16.gmra.mrb[28].mxu1 %vm521_vm1, %v8935_v54  ;;  %8271 = vmatmul.mubr.msk.bf16.vlgmr.msra.gmra.mrb[0].mxu0 %vm521_vm1, %v6151_v57  ;;  %v3374_v54 = vshll.u32 %v8961_v47, 16  ;;  %v6173_v57 = vsel %vm1956_vm3, %v6170_v4, %v6172_v48  ;;  %v8970_v47 = vld [vmem:[%s9169_s21 + $0xb8] sm:$0xff]  }
 0x176   : > { %8052 = vmatprep.mubr.msk.bf16.mxu1 %vm521_vm1, %v8937_v56  ;;  %8274 = vmatprep.mubr.msk.bf16.mxu0 %vm521_vm1, %v6153_v58  ;;  %v8958_v56 = vld [vmem:[%s9169_s21 + $0x88] sm:$0xff]   ;;  %v8960_v58 = vld [vmem:[%s9169_s21 + $0x90] sm:$0xff]  }
 0x177   : > { %v3376_v61 = vrot.slane %v3374_v54, 1  ;;  %v6176_v63 = vrot.slane %v8960_v58, 1  ;;  %v6186_v54 = vrot.slane %v8970_v47, 1 }
 0x179   : > { %v6179_v25 = vsel %vm1956_vm3, %v6176_v63, %v6178_v18 }
 0x17d   : > { %8053 = vmatmul.mubr.msk.bf16.gmra.mrb[32].mxu1 %vm521_vm1, %v8939_v60  ;;  %8275 = vmatmul.mubr.msk.bf16.gmra.mrb[4].mxu0 %vm521_vm1, %v6155_v62  ;;  %v3372_v60 = vor.u32 %v3370_v53, %v3368_v31  ;;  %v6174_v62 = vrot.slane %v8958_v56, 1  ;;  %v3424_v53 = vrot.slane %v3422_v45, 1  ;;  %v3430_v31 = vshll.u32 %v8975_v51, 16 }
 0x17e   : > { %8056 = vmatprep.mubr.msk.bf16.mxu1 %vm521_vm1, %v8941_v28  ;;  %8278 = vmatprep.mubr.msk.bf16.mxu0 %vm521_vm1, %v6157_v0  ;;  %v8965_v28 = vld [vmem:[%s9169_s21 + $0xa4] sm:$0xff]   ;;  %v3382_v0 = vshll.u32 %v8963_v59, 16  ;;  %v6187_v59 = vsel %vm1956_vm3, %v6184_v40, %v6186_v54 }
 0x180   : > { %v3384_v11 = vrot.slane %v3382_v0, 1 }
 0x182   : > { %v3388_v15 = vor.u32 %v3386_v5, %v3384_v11 }
 0x185   : > { %8057 = vmatmul.mubr.msk.bf16.gmra.mrb[36].mxu1 %vm521_vm1, %v8943_v3  ;;  %8279 = vmatmul.mubr.msk.bf16.gmra.mrb[8].mxu0 %vm521_vm1, %v6159_v8  ;;  %v3377_v3 = vsel %vm1141_vm2, %v3372_v60, %v3376_v61  ;;  %v6175_v8 = vsel %vm1956_vm3, %v6172_v48, %v6174_v62 }
 0x186   : > { %8060 = vmatprep.mubr.msk.bf16.mxu1 %vm521_vm1, %v8945_v6  ;;  %8282 = vmatprep.mubr.msk.bf16.mxu0 %vm521_vm1, %v6161_v10  ;;  %v3390_v6 = vshll.u32 %v8965_v28, 16  ;;  %v6177_v10 = vsel %vm1956_vm3, %v6174_v62, %v6176_v63  ;;  %v3432_v62 = vrot.slane %v3430_v31, 1  ;;  %v6190_v63 = vrot.slane %v8974_v30, 1 }
 0x18d   : > { %8061 = vmatmul.mubr.msk.bf16.gmra.mrb[40].mxu1 %vm521_vm1, %v8947_v14  ;;  %8283 = vmatmul.mubr.msk.bf16.gmra.mrb[12].mxu0 %vm521_vm1, %v6163_v19  ;;  %v3380_v14 = vor.u32 %v3378_v2, %v3376_v61  ;;  %v3398_v19 = vshll.u32 %v8967_v13, 16  ;;  %v8976_v61 = vld [vmem:[%s9169_s21 + $0xd0] sm:$0xff]  }
 0x18e   : > { %8064 = vmatprep.mubr.msk.bf16.mxu1 %vm521_vm1, %v8949_v16  ;;  %8286 = vmatprep.mubr.msk.bf16.mxu0 %vm521_vm1, %v6165_v21  ;;  %v3392_v16 = vrot.slane %v3390_v6, 1  ;;  %v3394_v21 = vshrl.u32 %v8965_v28, 16  ;;  %v6192_v0 = vrot.slane %v8976_v61, 1 }
 0x18f   : > { %v3385_v20 = vsel %vm1141_vm2, %v3380_v14, %v3384_v11 }
 0x190   : > { %v3393_v22 = vsel %vm1141_vm2, %v3388_v15, %v3392_v16  ;;  %v3396_v34 = vor.u32 %v3394_v21, %v3392_v16  ;;  %v6193_v5 = vsel %vm1956_vm3, %v6190_v63, %v6192_v0 }
 0x195   : > { %8065 = vmatmul.mubr.msk.bf16.gmra.mrb[44].mxu1 %vm521_vm1, %v8951_v29  ;;  %8287 = vmatmul.mubr.msk.bf16.gmra.mrb[16].mxu0 %vm521_vm1, %v6167_v39  ;;  %v3400_v29 = vrot.slane %v3398_v19, 1  ;;  %v6182_v39 = vrot.slane %v8966_v26, 1 }
 0x196   : > { %8094 = vmatprep.mubr.msk.bf16.mxu1 %vm521_vm1, %v3345_v35  ;;  %8290 = vmatprep.mubr.msk.bf16.mxu0 %vm521_vm1, %v6169_v37  ;;  %v3414_v37 = vshll.u32 %v8971_v33, 16 }
 0x197   : > { %v3404_v35 = vor.u32 %v3402_v23, %v3400_v29  ;;  %v3401_v41 = vsel %vm1141_vm2, %v3396_v34, %v3400_v29  ;;  %v6183_v46 = vsel %vm1956_vm3, %v6180_v7, %v6182_v39  ;;  %v6185_v4 = vsel %vm1956_vm3, %v6182_v39, %v6184_v40 }
 0x198   : > { %v3416_v48 = vrot.slane %v3414_v37, 1  ;;  %v9834_v37 = vld [vmem:[%s9989_s3] ss:$0 sm:$0xff] }
 0x199   : > { %v3409_v43 = vsel %vm1141_vm2, %v3404_v35, %v3408_v36 }
 0x19d   : > { %8095 = vmatmul.mubr.msk.bf16.vlgmr.msra.gmra.mrb[24].mxu1 %vm521_vm1, %v3353_v50  ;;  %8291 = vmatmul.mubr.msk.bf16.gmra.mrb[20].mxu0 %vm521_vm1, %v6171_v55  ;;  %v3412_v50 = vor.u32 %v3410_v42, %v3408_v36  ;;  %v6188_v55 = vrot.slane %v8972_v49, 1 }
 0x19e   : > { %8098 = vmatprep.mubr.msk.bf16.mxu1 %vm521_vm1, %v3361_v52  ;;  %8294 = vmatprep.mubr.msk.bf16.mxu0 %vm521_vm1, %v6173_v57  ;;  %v3420_v52 = vor.u32 %v3418_v44, %v3416_v48  ;;  %v3426_v57 = vshrl.u32 %v8973_v38, 16  ;;  %v9829_v38 = vld [vmem:[%s9988_s2] ss:$0 sm:$0xff] }
 0x19f   : > { %v3417_v56 = vsel %vm1141_vm2, %v3412_v50, %v3416_v48  ;;  %v6189_v60 = vsel %vm1956_vm3, %v6186_v54, %v6188_v55  ;;  %v6191_v2 = vsel %vm1956_vm3, %v6188_v55, %v6190_v63 }
 0x1a0   : > { %v3425_v58 = vsel %vm1141_vm2, %v3420_v52, %v3424_v53  ;;  %v3428_v28 = vor.u32 %v3426_v57, %v3424_v53 }
 0x1a5   : > { %8099 = vmatmul.mubr.msk.bf16.gmra.mrb[28].mxu1 %vm521_vm1, %v3369_v1  ;;  %8295 = vmatmul.mubr.msk.bf16.gmra.mrb[24].mxu0 %vm521_vm1, %v6175_v8  ;;  %v3433_v1 = vsel %vm1141_vm2, %v3428_v28, %v3432_v62 }
 0x1a6   : > { %8102 = vmatprep.mubr.msk.bf16.mxu1 %vm521_vm1, %v3377_v3  ;;  %8298 = vmatprep.mubr.msk.bf16.mxu0 %vm521_vm1, %v6177_v10  ;;  %v8977_v3 = vld [vmem:[%s9169_s21 + $0xd8] ss:$0 sps:$4 sm:$0x11]  }
 0x1a7   : > { %v6194_v6 = vrot.slane %v8977_v3, 1 }
 0x1a9   : > { %v6195_v8 = vsel %vm1956_vm3, %v6192_v0, %v6194_v6 }
 0x1ad   : > { %8103 = vmatmul.mubr.msk.bf16.gmra.mrb[32].mxu1 %vm521_vm1, %v3385_v20  ;;  %8299 = vmatmul.mubr.msk.bf16.gmra.mrb[28].mxu0 %vm521_vm1, %v6179_v25 }
 0x1ae   : > { %8106 = vmatprep.mubr.msk.bf16.mxu1 %vm521_vm1, %v3393_v22  ;;  %8302 = vmatprep.mubr.msk.bf16.mxu0 %vm521_vm1, %v6181_v27 }
 0x1b5   : > { %8107 = vmatmul.mubr.msk.bf16.gmra.mrb[36].mxu1 %vm521_vm1, %v3401_v41  ;;  %8303 = vmatmul.mubr.msk.bf16.gmra.mrb[32].mxu0 %vm521_vm1, %v6183_v46 }
 0x1b6   : > { %8110 = vmatprep.mubr.msk.bf16.mxu1 %vm521_vm1, %v3409_v43  ;;  %8306 = vmatprep.mubr.msk.bf16.mxu0 %vm521_vm1, %v6185_v4 }
 0x1bd   : > { %8111 = vmatmul.mubr.msk.bf16.gmra.mrb[40].mxu1 %vm521_vm1, %v3417_v56  ;;  %8307 = vmatmul.mubr.msk.bf16.gmra.mrb[36].mxu0 %vm521_vm1, %v6187_v59 }
 0x1be   : > { %8114 = vmatprep.mubr.msk.bf16.mxu1 %vm521_vm1, %v3425_v58  ;;  %8310 = vmatprep.mubr.msk.bf16.mxu0 %vm521_vm1, %v6189_v60 }
 0x1c5   : > { %8115 = vmatmul.mubr.msk.bf16.gmra.mrb[44].mxu1 %vm521_vm1, %v3433_v1  ;;  %8311 = vmatmul.mubr.msk.bf16.gmra.mrb[40].mxu0 %vm521_vm1, %v6191_v2 }
 0x1c6   : > { %8314 = vmatprep.mubr.msk.bf16.mxu0 %vm521_vm1, %v6193_v5 }
 0x1cd   : > { %8315 = vmatmul.mubr.msk.bf16.gmra.mrb[44].mxu0 %vm521_vm1, %v6195_v8 }
 0x210   : > { %v8022_v9 = vpop.f32.mrb[0].mxu1 }
 0x211   : > { %v2729_v10 = vpop.f32.mrb[1].mxu1 }
 0x212   : > { %v8023_v11 = vpop.f32.mrb[2].mxu1 }
 0x213   : > { %v2732_v12 = vpop.f32.mrb[3].mxu1 }
 0x218   : > { %v8026_v13 = vpop.f32.mrb[4].mxu1 }
 0x219   : > { %v2745_v14 = vpop.f32.mrb[5].mxu1 }
 0x21a   : > { %v8027_v15 = vpop.f32.mrb[6].mxu1 }
 0x21b   : > { %v2748_v16 = vpop.f32.mrb[7].mxu1 }
 0x220   : > { %v8030_v17 = vpop.f32.mrb[8].mxu1 }
 0x221   : > { %v2761_v18 = vpop.f32.mrb[9].mxu1 }
 0x222   : > { %v8031_v7 = vpop.f32.mrb[10].mxu1 }
 0x223   : > { %v2764_v19 = vpop.f32.mrb[11].mxu1 }
 0x228   : > { %v8034_v20 = vpop.f32.mrb[12].mxu1 }
 0x229   : > { %v9810_v21 = vpop.f32.mrb[13].mxu1 }
 0x22a   : > { %v9812_v22 = vpop.f32.mrb[14].mxu1 }
 0x22b   : > { %v9814_v23 = vpop.f32.mrb[15].mxu1 }
 0x230   : > { %v9816_v24 = vpop.f32.mrb[16].mxu1 }
 0x231   : > { %v9818_v25 = vpop.f32.mrb[17].mxu1 }
 0x232   : > { %v9820_v26 = vpop.f32.mrb[18].mxu1 }
 0x233   : > { %v2796_v27 = vpop.f32.mrb[19].mxu1 }
 0x238   : > { %v9822_v29 = vpop.f32.mrb[20].mxu1 }
 0x239   : > { %v2809_v32 = vpop.f32.mrb[21].mxu1 }
 0x23a   : > { %v8043_v33 = vpop.f32.mrb[22].mxu1 }
 0x23b   : > { %v9824_v34 = vpop.f32.mrb[23].mxu1 }
 0x248   : > { %v8272_v35 = vpop.f32.mrb[0].mxu0 }
 0x249   : > { %v6305_v36 = vpop.f32.mrb[1].mxu0 }
 0x24a   : > { %v8320_v39 = vadd.f32 %v6305_v36, %v2729_v10  ;;  %v8273_v40 = vpop.f32.mrb[2].mxu0 }
 0x24b   : > { %v8321_v41 = vadd.f32 %v8273_v40, %v8023_v11  ;;  %v6308_v42 = vpop.f32.mrb[3].mxu0 }
 0x24c   : > { %v6631_v43 = vmul.f32 %v8320_v39, %v9829_v38  ;;  %v8322_v44 = vadd.f32 %v6308_v42, %v2732_v12 }
 0x24d   : > { %v6633_v47 = vmul.f32 %v8321_v41, %v9829_v38 }
 0x24e   : > { %v6670_v45 = vadd.f32 %v9834_v37, %v6631_v43  ;;  %v6632_v46 = vmul.f32 %v8322_v44, %v9829_v38 }
 0x24f   : > { %v6672_v31 = vadd.f32 %v9834_v37, %v6633_v47 }
 0x250   : > { %v6671_v4 = vadd.f32 %v9834_v37, %v6632_v46  ;;  %v8276_v48 = vpop.f32.mrb[4].mxu0  ;;  %v6702_v51 = vmax.f32 %v6670_v45, 0.0 }
 0x251   : > { %v8323_v49 = vadd.f32 %v8276_v48, %v8026_v13  ;;  %v6321_v50 = vpop.f32.mrb[5].mxu0  ;;  %v6704_v62 = vmax.f32 %v6672_v31, 0.0 }
 0x252   : > { %v6703_v52 = vmax.f32 %v6671_v4, 0.0  ;;  %v8324_v53 = vadd.f32 %v6321_v50, %v2745_v14  ;;  %v8277_v54 = vpop.f32.mrb[6].mxu0 }
 0x253   : > { %v6635_v55 = vmul.f32 %v8323_v49, %v9829_v38  ;;  %v8325_v56 = vadd.f32 %v8277_v54, %v8027_v15  ;;  %v6324_v57 = vpop.f32.mrb[7].mxu0 }
 0x254   : > { %v7551_v58 = vpack.c.bf16 %v6703_v52, %v6702_v51  ;;  %v6634_v59 = vmul.f32 %v8324_v53, %v9829_v38 }
 0x255   : > { %v6674_v30 = vadd.f32 %v9834_v37, %v6635_v55  ;;  %v6636_v60 = vmul.f32 %v8325_v56, %v9829_v38 }
 0x256   : > { %7552 = vst [vmem:[%s9849_s26] sm:$0xff] %v7551_v58   ;;  %v6673_v61 = vadd.f32 %v9834_v37, %v6634_v59 }
 0x257   : > { %v6675_v28 = vadd.f32 %v9834_v37, %v6636_v60  ;;  %v6706_v1 = vmax.f32 %v6674_v30, 0.0 }
 0x258   : > { %v6705_v63 = vmax.f32 %v6673_v61, 0.0  ;;  %v8280_v0 = vpop.f32.mrb[8].mxu0 }
 0x259   : > { %v6707_v2 = vmax.f32 %v6675_v28, 0.0  ;;  %v8326_v3 = vadd.f32 %v8280_v0, %v8030_v17  ;;  %v6337_v5 = vpop.f32.mrb[9].mxu0 }
 0x25a   : > { %v7556_v6 = vpack.c.bf16 %v6705_v63, %v6704_v62  ;;  %v8281_v8 = vpop.f32.mrb[10].mxu0 }
 0x25b   : > { %v7561_v9 = vpack.c.bf16 %v6707_v2, %v6706_v1  ;;  %v6638_v10 = vmul.f32 %v8326_v3, %v9829_v38  ;;  %v6340_v11 = vpop.f32.mrb[11].mxu0 }
 0x25c   : > { %7628 = vst [vmem:[%s9849_s26 + $0x8] sm:$0xff] %v7556_v6   ;;  %v8327_v12 = vadd.f32 %v6340_v11, %v2764_v19 }
 0x25d   : > { %7629 = vst [vmem:[%s9849_s26 + $0x10] sm:$0xff] %v7561_v9   ;;  %v6677_v13 = vadd.f32 %v9834_v37, %v6638_v10 }
 0x25e   : > { %v6637_v14 = vmul.f32 %v8327_v12, %v9829_v38 }
 0x25f   : > { %v6709_v17 = vmax.f32 %v6677_v13, 0.0 }
 0x260   : > { %v6676_v15 = vadd.f32 %v9834_v37, %v6637_v14  ;;  %v8284_v16 = vpop.f32.mrb[12].mxu0 }
 0x261   : > { %v6353_v18 = vpop.f32.mrb[13].mxu0 }
 0x262   : > { %v6708_v7 = vmax.f32 %v6676_v15, 0.0  ;;  %v8328_v20 = vadd.f32 %v6353_v18, %v9810_v21  ;;  %v8285_v27 = vpop.f32.mrb[14].mxu0 }
 0x263   : > { %v8329_v32 = vadd.f32 %v8285_v27, %v9812_v22  ;;  %v6356_v33 = vpop.f32.mrb[15].mxu0 }
 0x264   : > { %v7566_v35 = vpack.c.bf16 %v6709_v17, %v6708_v7  ;;  %v6639_v19 = vmul.f32 %v8328_v20, %v9829_v38  ;;  %v8330_v36 = vadd.f32 %v6356_v33, %v9814_v23 }
 0x265   : > { %v6641_v41 = vmul.f32 %v8329_v32, %v9829_v38 }
 0x266   : > { %7630 = vst [vmem:[%s9849_s26 + $0x18] sm:$0xff] %v7566_v35   ;;  %v6678_v39 = vadd.f32 %v9834_v37, %v6639_v19  ;;  %v6640_v40 = vmul.f32 %v8330_v36, %v9829_v38 }
 0x267   : > { %v6680_v49 = vadd.f32 %v9834_v37, %v6641_v41 }
 0x268   : > { %v6679_v42 = vadd.f32 %v9834_v37, %v6640_v40  ;;  %v8288_v21 = vpop.f32.mrb[16].mxu0  ;;  %v6710_v44 = vmax.f32 %v6678_v39, 0.0 }
 0x269   : > { %v8331_v43 = vadd.f32 %v8288_v21, %v9816_v24  ;;  %v6369_v22 = vpop.f32.mrb[17].mxu0  ;;  %v6712_v56 = vmax.f32 %v6680_v49, 0.0 }
 0x26a   : > { %v6711_v45 = vmax.f32 %v6679_v42, 0.0  ;;  %v8332_v46 = vadd.f32 %v6369_v22, %v9818_v25  ;;  %v8289_v47 = vpop.f32.mrb[18].mxu0 }
 0x26b   : > { %v6643_v23 = vmul.f32 %v8331_v43, %v9829_v38  ;;  %v8333_v4 = vadd.f32 %v8289_v47, %v9820_v26  ;;  %v6372_v48 = vpop.f32.mrb[19].mxu0 }
 0x26c   : > { %v7571_v50 = vpack.c.bf16 %v6711_v45, %v6710_v44  ;;  %v6642_v51 = vmul.f32 %v8332_v46, %v9829_v38 }
 0x26d   : > { %v6682_v52 = vadd.f32 %v9834_v37, %v6643_v23  ;;  %v6644_v24 = vmul.f32 %v8333_v4, %v9829_v38 }
 0x26e   : > { %7631 = vst [vmem:[%s9849_s26 + $0x20] sm:$0xff] %v7571_v50   ;;  %v6681_v53 = vadd.f32 %v9834_v37, %v6642_v51 }
 0x26f   : > { %v6683_v25 = vadd.f32 %v9834_v37, %v6644_v24  ;;  %v6714_v58 = vmax.f32 %v6682_v52, 0.0 }
 0x270   : > { %v8096_v54 = vpop.f32.mrb[24].mxu1  ;;  %v6713_v26 = vmax.f32 %v6681_v53, 0.0  ;;  %v8292_v57 = vpop.f32.mrb[20].mxu0 }
 0x271   : > { %v3639_v55 = vpop.f32.mrb[25].mxu1  ;;  %v6715_v59 = vmax.f32 %v6683_v25, 0.0  ;;  %v8334_v30 = vadd.f32 %v8292_v57, %v9822_v29  ;;  %v6385_v60 = vpop.f32.mrb[21].mxu0 }
 0x272   : > { %v8097_v31 = vpop.f32.mrb[26].mxu1  ;;  %v7576_v28 = vpack.c.bf16 %v6713_v26, %v6712_v56  ;;  %v8293_v62 = vpop.f32.mrb[22].mxu0 }
 0x273   : > { %v3642_v61 = vpop.f32.mrb[27].mxu1  ;;  %v7581_v63 = vpack.c.bf16 %v6715_v59, %v6714_v58  ;;  %v6646_v0 = vmul.f32 %v8334_v30, %v9829_v38  ;;  %v6388_v1 = vpop.f32.mrb[23].mxu0 }
 0x274   : > { %7632 = vst [vmem:[%s9849_s26 + $0x28] sm:$0xff] %v7576_v28   ;;  %v8335_v2 = vadd.f32 %v6388_v1, %v9824_v34 }
 0x275   : > { %7633 = vst [vmem:[%s9849_s26 + $0x30] sm:$0xff] %v7581_v63   ;;  %v6685_v3 = vadd.f32 %v9834_v37, %v6646_v0 }
 0x276   : > { %v6645_v5 = vmul.f32 %v8335_v2, %v9829_v38 }
 0x277   : > { %v6717_v13 = vmax.f32 %v6685_v3, 0.0 }
 0x278   : > { %v8100_v6 = vpop.f32.mrb[28].mxu1  ;;  %v6684_v29 = vadd.f32 %v9834_v37, %v6645_v5  ;;  %v8296_v9 = vpop.f32.mrb[24].mxu0 }
 0x279   : > { %v3655_v8 = vpop.f32.mrb[29].mxu1  ;;  %v6401_v11 = vpop.f32.mrb[25].mxu0 }
 0x27a   : > { %v8101_v10 = vpop.f32.mrb[30].mxu1  ;;  %v6716_v14 = vmax.f32 %v6684_v29, 0.0  ;;  %v8336_v15 = vadd.f32 %v6401_v11, %v3639_v55  ;;  %v8297_v16 = vpop.f32.mrb[26].mxu0 }
 0x27b   : > { %v3658_v12 = vpop.f32.mrb[31].mxu1  ;;  %v8337_v18 = vadd.f32 %v8297_v16, %v8097_v31  ;;  %v6404_v34 = vpop.f32.mrb[27].mxu0 }
 0x27c   : > { %v7586_v17 = vpack.c.bf16 %v6717_v13, %v6716_v14  ;;  %v6647_v7 = vmul.f32 %v8336_v15, %v9829_v38  ;;  %v8338_v20 = vadd.f32 %v6404_v34, %v3642_v61 }
 0x27d   : > { %v6649_v19 = vmul.f32 %v8337_v18, %v9829_v38 }
 0x27e   : > { %7634 = vst [vmem:[%s9849_s26 + $0x38] sm:$0xff] %v7586_v17   ;;  %v6686_v27 = vadd.f32 %v9834_v37, %v6647_v7  ;;  %v6648_v32 = vmul.f32 %v8338_v20, %v9829_v38 }
 0x27f   : > { %v6688_v4 = vadd.f32 %v9834_v37, %v6649_v19 }
 0x280   : > { %v8104_v33 = vpop.f32.mrb[32].mxu1  ;;  %v6687_v36 = vadd.f32 %v9834_v37, %v6648_v32  ;;  %v8300_v39 = vpop.f32.mrb[28].mxu0  ;;  %v6718_v43 = vmax.f32 %v6686_v27, 0.0 }
 0x281   : > { %v3671_v35 = vpop.f32.mrb[33].mxu1  ;;  %v8339_v41 = vadd.f32 %v8300_v39, %v8100_v6  ;;  %v6417_v42 = vpop.f32.mrb[29].mxu0  ;;  %v6720_v25 = vmax.f32 %v6688_v4, 0.0 }
 0x282   : > { %v8105_v40 = vpop.f32.mrb[34].mxu1  ;;  %v6719_v22 = vmax.f32 %v6687_v36, 0.0  ;;  %v8340_v44 = vadd.f32 %v6417_v42, %v3655_v8  ;;  %v8301_v45 = vpop.f32.mrb[30].mxu0 }
 0x283   : > { %v3674_v21 = vpop.f32.mrb[35].mxu1  ;;  %v6651_v46 = vmul.f32 %v8339_v41, %v9829_v38  ;;  %v8341_v47 = vadd.f32 %v8301_v45, %v8101_v10  ;;  %v6420_v23 = vpop.f32.mrb[31].mxu0 }
 0x284   : > { %v7591_v48 = vpack.c.bf16 %v6719_v22, %v6718_v43  ;;  %v6650_v49 = vmul.f32 %v8340_v44, %v9829_v38 }
 0x285   : > { %v6690_v50 = vadd.f32 %v9834_v37, %v6651_v46  ;;  %v6652_v51 = vmul.f32 %v8341_v47, %v9829_v38 }
 0x286   : > { %7635 = vst [vmem:[%s9849_s26 + $0x40] sm:$0xff] %v7591_v48   ;;  %v6689_v52 = vadd.f32 %v9834_v37, %v6650_v49 }
 0x287   : > { %v6691_v53 = vadd.f32 %v9834_v37, %v6652_v51  ;;  %v6722_v57 = vmax.f32 %v6690_v50, 0.0 }
 0x288   : > { %v8108_v24 = vpop.f32.mrb[36].mxu1  ;;  %v6721_v55 = vmax.f32 %v6689_v52, 0.0  ;;  %v8304_v56 = vpop.f32.mrb[32].mxu0 }
 0x289   : > { %v3687_v54 = vpop.f32.mrb[37].mxu1  ;;  %v6723_v31 = vmax.f32 %v6691_v53, 0.0  ;;  %v8342_v58 = vadd.f32 %v8304_v56, %v8104_v33  ;;  %v6433_v59 = vpop.f32.mrb[33].mxu0 }
 0x28a   : > { %v8109_v26 = vpop.f32.mrb[38].mxu1  ;;  %v7596_v60 = vpack.c.bf16 %v6721_v55, %v6720_v25  ;;  %v8305_v61 = vpop.f32.mrb[34].mxu0 }
 0x28b   : > { %v3690_v30 = vpop.f32.mrb[39].mxu1  ;;  %v7601_v28 = vpack.c.bf16 %v6723_v31, %v6722_v57  ;;  %v6654_v62 = vmul.f32 %v8342_v58, %v9829_v38  ;;  %v6436_v63 = vpop.f32.mrb[35].mxu0 }
 0x28c   : > { %7636 = vst [vmem:[%s9849_s26 + $0x48] sm:$0xff] %v7596_v60   ;;  %v8343_v0 = vadd.f32 %v6436_v63, %v3674_v21 }
 0x28d   : > { %7637 = vst [vmem:[%s9849_s26 + $0x50] sm:$0xff] %v7601_v28   ;;  %v6693_v1 = vadd.f32 %v9834_v37, %v6654_v62 }
 0x28e   : > { %v6653_v2 = vmul.f32 %v8343_v0, %v9829_v38 }
 0x28f   : > { %v6725_v11 = vmax.f32 %v6693_v1, 0.0 }
 0x290   : > { %v8112_v3 = vpop.f32.mrb[40].mxu1  ;;  %v6692_v6 = vadd.f32 %v9834_v37, %v6653_v2  ;;  %v8308_v8 = vpop.f32.mrb[36].mxu0 }
 0x291   : > { %v3703_v5 = vpop.f32.mrb[41].mxu1  ;;  %v6449_v9 = vpop.f32.mrb[37].mxu0 }
 0x292   : > { %v8113_v29 = vpop.f32.mrb[42].mxu1  ;;  %v6724_v12 = vmax.f32 %v6692_v6, 0.0  ;;  %v8344_v13 = vadd.f32 %v6449_v9, %v3687_v54  ;;  %v8309_v14 = vpop.f32.mrb[38].mxu0 }
 0x293   : > { %v3706_v10 = vpop.f32.mrb[43].mxu1  ;;  %v8345_v15 = vadd.f32 %v8309_v14, %v8109_v26  ;;  %v6452_v16 = vpop.f32.mrb[39].mxu0 }
 0x294   : > { %v7606_v18 = vpack.c.bf16 %v6725_v11, %v6724_v12  ;;  %v6655_v34 = vmul.f32 %v8344_v13, %v9829_v38  ;;  %v8346_v17 = vadd.f32 %v6452_v16, %v3690_v30 }
 0x295   : > { %v6657_v33 = vmul.f32 %v8345_v15, %v9829_v38 }
 0x296   : > { %7638 = vst [vmem:[%s9849_s26 + $0x58] sm:$0xff] %v7606_v18   ;;  %v6694_v7 = vadd.f32 %v9834_v37, %v6655_v34  ;;  %v6656_v20 = vmul.f32 %v8346_v17, %v9829_v38 }
 0x297   : > { %v6696_v47 = vadd.f32 %v9834_v37, %v6657_v33 }
 0x298   : > { %v8116_v27 = vpop.f32.mrb[44].mxu1  ;;  %v6695_v35 = vadd.f32 %v9834_v37, %v6656_v20  ;;  %v8312_v19 = vpop.f32.mrb[40].mxu0  ;;  %v6726_v42 = vmax.f32 %v6694_v7, 0.0 }
 0x299   : > { %v3719_v32 = vpop.f32.mrb[45].mxu1  ;;  %v8347_v39 = vadd.f32 %v8312_v19, %v8112_v3  ;;  %v6465_v40 = vpop.f32.mrb[41].mxu0  ;;  %v6728_v52 = vmax.f32 %v6696_v47, 0.0 }
 0x29a   : > { %v8117_v36 = vpop.f32.mrb[46].mxu1  ;;  %v6727_v21 = vmax.f32 %v6695_v35, 0.0  ;;  %v8348_v43 = vadd.f32 %v6465_v40, %v3703_v5  ;;  %v8313_v22 = vpop.f32.mrb[42].mxu0 }
 0x29b   : > { %v3722_v41 = vpop.f32.mrb[47].mxu1  ;;  %v6659_v44 = vmul.f32 %v8347_v39, %v9829_v38  ;;  %v8349_v45 = vadd.f32 %v8313_v22, %v8113_v29  ;;  %v6468_v46 = vpop.f32.mrb[43].mxu0 }
 0x29c   : > { %v7611_v23 = vpack.c.bf16 %v6727_v21, %v6726_v42  ;;  %v6658_v4 = vmul.f32 %v8348_v43, %v9829_v38 }
 0x29d   : > { %v6698_v48 = vadd.f32 %v9834_v37, %v6659_v44  ;;  %v6660_v49 = vmul.f32 %v8349_v45, %v9829_v38 }
 0x29e   : > { %7639 = vst [vmem:[%s9849_s26 + $0x60] sm:$0xff] %v7611_v23   ;;  %v6697_v50 = vadd.f32 %v9834_v37, %v6658_v4 }
 0x29f   : > { %v6699_v51 = vadd.f32 %v9834_v37, %v6660_v49  ;;  %v6730_v54 = vmax.f32 %v6698_v48, 0.0 }
 0x2a0   : > { %v6729_v24 = vmax.f32 %v6697_v50, 0.0  ;;  %v8316_v53 = vpop.f32.mrb[44].mxu0 }
 0x2a1   : > { %v6731_v25 = vmax.f32 %v6699_v51, 0.0  ;;  %v8350_v55 = vadd.f32 %v8316_v53, %v8116_v27  ;;  %v6481_v56 = vpop.f32.mrb[45].mxu0 }
 0x2a2   : > { %v7616_v26 = vpack.c.bf16 %v6729_v24, %v6728_v52  ;;  %v8317_v57 = vpop.f32.mrb[46].mxu0 }
 0x2a3   : > { %v7621_v31 = vpack.c.bf16 %v6731_v25, %v6730_v54  ;;  %v6662_v58 = vmul.f32 %v8350_v55, %v9829_v38  ;;  %v6484_v59 = vpop.f32.mrb[47].mxu0 }
 0x2a4   : > { %7640 = vst [vmem:[%s9849_s26 + $0x68] sm:$0xff] %v7616_v26   ;;  %v8351_v30 = vadd.f32 %v6484_v59, %v3722_v41 }
 0x2a5   : > { %7641 = vst [vmem:[%s9849_s26 + $0x70] sm:$0xff] %v7621_v31   ;;  %v6701_v60 = vadd.f32 %v9834_v37, %v6662_v58 }
 0x2a6   : > { %v6661_v61 = vmul.f32 %v8351_v30, %v9829_v38 }
 0x2a7   : > { %v6733_v62 = vmax.f32 %v6701_v60, 0.0 }
 0x2a8   : > { %v6700_v28 = vadd.f32 %v9834_v37, %v6661_v61 }
 0x2aa   : > { %v6732_v63 = vmax.f32 %v6700_v28, 0.0 }
 0x2ac   : > { %v7626_v0 = vpack.c.bf16 %v6733_v62, %v6732_v63 }
 0x2ae   : > { %7642 = vst [vmem:[%s9849_s26 + $0x78] sm:$0xff] %v7626_v0  }
 0x2af   : > { %8993 = shalt.err (!%p8990_p5)
}
 0x2b0   : > { %s8994_s12 = scalar_lea.hbm %s9933_s7, 2048  ;;  %s8998_s21 = scalar_lea.hbm %s9990_s4, 4096 }
 0x2b1   : > { %p8995_p6 = scmp.ne.s32.totalorder %s9933_s7, %s8994_s12  ;;  %p8999_p10 = scmp.lt.u32.totalorder %s9933_s7, %s9990_s4 }
 0x2b2   : > { %p9000_p11 = scmp.lt.u32.totalorder %s8998_s21, %s8994_s12  ;;  %p9002_p13 = scmp.lt.u32.totalorder %s8994_s12, %s9933_s7 }
 0x2b3   : > { %p8996_p7 = pnand %p8995_p6, %p9128_p4 }
 0x2b4   : > { %p9001_p12 = por %p9000_p11, %p8999_p10 }
 0x2b5   : > { %p8997_p9 = pneg %p8996_p7 }
 0x2b6   : > { %p9003_p0 = por %p9002_p13, %p9001_p12 }
 0x2b8   : > { %p9004_p1 = pnand %p9003_p0, %p8997_p9 }
 0x2ba   : > { %9007 = shalt.err (!%p9004_p1)
}
 0x2bb   : > { %s9061_s26 = smov 64   ;;  %s9062_s29 = smov 4  }
 0x2bc   : > { %8699 = dma.vmem_to_hbm [thread:$0]  (%p9128_p4), %s9935_s30, 2048, %s9933_s7, %s9940_s8, %s9061_s26, %s9061_s26, %s9062_s29  }
 0x2bd PF: > { %p8705_p2 = scmp.ge.s32.totalorder %s9058_s20, 2  ;;  %s6924_s5 = sand.u32 1, %s9038_s15  }
 0x2be   : > { %s6925_s6 = scalar_lea.sflag [#allocation4], %s6924_s5 }
 0x2bf   : > { %p8702_p3 = pnand %p8705_p2, %p9135_p8 }
 0x2c1   : > { %9033 = dma.done.wait (!%p8702_p3), %s6925_s6, 2048  }
 0x2c2   : > { %9035 = vsyncadd (!%p8702_p3), %s6925_s6, 4294965248  ;;  %s17_s20 = sadd.s32 1, %s9058_s20   ;;  %s9993_s15 = smov %s9042_s16 }
 0x2c3   : > { %p14_p5 = scmp.ge.s32.totalorder %s17_s20, 4   ;;  %s9994_s16 = smov %s9046_s17 }
 0x2c4   : > { %s9995_s17 = smov %s9141_s28  ;;  %s9996_s18 = smov %s9054_s19 }
 0x2c5   : > { %s9997_s19 = smov %s9999_s23  ;;  %16 = sbr.rel (!%p14_p5) target bundleno = 4 (0x4), region = 88 }
 0x2cc   :  { %6930 = vsyncpa [#allocation4], 1 }
 0x2cd   :  { %6932 = vsyncpa [#allocation4 + $0x1], 1 }

</bundles_post_ra>
